<compile_context>
chip_gen: v7x
topology: tpu7x:2x2x1
jax: 0.10.0
libtpu: 0.0.40
codegen_flags: <defaults>
</compile_context>

<pallas_src>
import math

import jax
import jax.numpy as jnp
from jax import lax
from jax.experimental import pallas as pl
from jax.experimental.pallas import tpu as pltpu


def ogcrnn_kernel(xg_ref, a_ref, wh_ref, wc_ref, bc_ref, out_ref, hall_ref):
    """One batch element per grid step.

    xg_ref  : (T, N, 4C)   precomputed input-side gate pre-activations
                           (incl. gcn bias; j-columns pre-scaled by 2)
    a_ref   : ((K-1)*N, N) stacked Chebyshev supports [A ; 2A@A - I ; ...]
    wh_ref  : (K*C, 4C)    hidden-side gcn weight, rows ordered (k, channel),
                           j-columns pre-scaled by 2
    wc_ref  : (T*C, P)     (1, T) conv-head weight, lane-padded to P = 128
    bc_ref  : (1, P)       conv-head bias, lane-padded
    out_ref : (N, P)       conv-head output (lane-padded)
    hall_ref: (N, T*C)     scratch collecting every h_t for the deferred conv head
    """
    T, N, G = xg_ref.shape
    C = G // 4
    K = wh_ref.shape[0] // C

    a_stack = a_ref[...]                                        # ((K-1)*N, N)
    w_k = [wh_ref[k * C:(k + 1) * C, :] for k in range(K)]      # each (C, 4C)

    h = jnp.zeros((N, C), jnp.float32)
    c = jnp.zeros((N, C), jnp.float32)

    # T is static and small: full unroll gives the scheduler visibility across
    # steps (next step's MXU pushes overlap this step's EUP/VALU tail).
    for t in range(T):
        # all hidden-side Chebyshev hops in one matmul: [A@h ; A2@h ; ...]
        ah = jnp.dot(a_stack, h, preferred_element_type=jnp.float32)
        gates = xg_ref[t] + jnp.dot(h, w_k[0],
                                    preferred_element_type=jnp.float32)
        for k in range(1, K):
            gates = gates + jnp.dot(ah[(k - 1) * N:k * N, :], w_k[k],
                                    preferred_element_type=jnp.float32)

        # single full-vreg sigmoid on the (N, 4C = 128) tile; the j-gate tanh
        # is recovered via tanh(g) = 2*sigmoid(2g) - 1 (2x pre-scale baked into
        # the weights/bias in the wrapper).
        sig = jax.nn.sigmoid(gates)
        i_s = sig[:, 0:C]
        j_t = 2.0 * sig[:, C:2 * C] - 1.0
        f_s = sig[:, 2 * C:3 * C]
        o_s = sig[:, 3 * C:4 * C]

        c = c * f_s + i_s * j_t
        h = jnp.tanh(c) * o_s
        hall_ref[:, t * C:(t + 1) * C] = h

    # deferred (1, T) conv head: a single (N, T*C) x (T*C, P) matmul
    out_ref[...] = (jnp.dot(hall_ref[...], wc_ref[...],
                            preferred_element_type=jnp.float32)
                    + bc_ref[...])


@jax.jit
def ogcrnn_forward(x, params, supports):
    """Inference-mode OGCRNN.forward -> (conv_out, A, A)."""
    B, Cin, N, T = x.shape
    Wc = params["w_conv"]                          # (OUT, C, 1, T)
    OUT, C = Wc.shape[0], Wc.shape[1]
    Wg = params["w_gcn"][:, :, 0]                  # (4C, K*(Cin+C))
    K = Wg.shape[1] // (Cin + C)
    P = 128                                        # lane-dense padded conv width

    # --- BatchNorm2d(in_dim, affine=False), inference mode (running stats) ---
    # TODO(synk): training-mode batch statistics and F.dropout(A, 0.5) are not
    # modeled; this implements eval()/inference forward semantics.
    mean = params["bn_mean"].reshape(1, Cin, 1, 1)
    var = params["bn_var"].reshape(1, Cin, 1, 1)
    xb = (x - mean) * lax.rsqrt(var + 1e-5)

    # --- adjacency preprocessing (tiny (N,N) math, also a module output) ---
    A = params["h_adj"] + supports[0]
    d = 1.0 / (jnp.sum(A, -1) + 1e-4)
    A = d[:, None] * A
    cheb = [jnp.eye(N, dtype=jnp.float32), A]
    for _ in range(2, K):
        cheb.append(2.0 * (A @ cheb[-1]) - cheb[-2])
    a_stack = jnp.concatenate(cheb[1:], axis=0)                  # ((K-1)*N, N)

    # --- hoist the input-side gate projection off the serial recurrence ---
    Wx = Wg[:, :Cin * K].reshape(4 * C, Cin, K)                  # x channels
    Wh = jnp.transpose(Wg[:, Cin * K:].reshape(4 * C, C, K),
                       (2, 1, 0)).reshape(K * C, 4 * C)          # rows (k, channel)
    Ls = jnp.stack(cheb, 0)                                      # (K, N, N)
    px = jnp.einsum('kqn,bcnt->btqck', Ls, xb)
    x_gates = jnp.einsum('btqck,ock->btqo', px, Wx) + params["b_gcn"]

    # bake the "tanh(g) = 2*sigmoid(2g) - 1" pre-scale into the j-gate columns
    j_scale = jnp.ones((4 * C,), jnp.float32).at[C:2 * C].set(2.0)
    x_gates = x_gates * j_scale
    Wh = Wh * j_scale

    # --- (1, T) conv head, flattened over (t, channel), lane-padded 12->128 ---
    wc_flat = jnp.transpose(Wc[:, :, 0, :], (2, 1, 0)).reshape(T * C, OUT)
    wc_pad = jnp.zeros((T * C, P), jnp.float32).at[:, :OUT].set(wc_flat)
    bc_pad = jnp.zeros((1, P), jnp.float32).at[0, :OUT].set(params["b_conv"])

    conv_pad = pl.pallas_call(
        ogcrnn_kernel,
        out_shape=jax.ShapeDtypeStruct((B, N, P), jnp.float32),
        grid_spec=pltpu.PrefetchScalarGridSpec(
            num_scalar_prefetch=0,
            grid=(B,),
            in_specs=[
                pl.BlockSpec((None, T, N, 4 * C), lambda b: (b, 0, 0, 0)),
                pl.BlockSpec(((K - 1) * N, N), lambda b: (0, 0)),
                pl.BlockSpec((K * C, 4 * C), lambda b: (0, 0)),
                pl.BlockSpec((T * C, P), lambda b: (0, 0)),
                pl.BlockSpec((1, P), lambda b: (0, 0)),
            ],
            out_specs=pl.BlockSpec((None, N, P), lambda b: (b, 0, 0)),
            scratch_shapes=[pltpu.VMEM((N, T * C), jnp.float32)],
        ),
        compiler_params=pltpu.CompilerParams(
            dimension_semantics=("parallel",)),
    )(x_gates, a_stack, Wh, wc_pad, bc_pad)

    conv_out = jnp.transpose(conv_pad[:, :, :OUT], (0, 2, 1))[..., None]
    return conv_out, A, A


def reference_forward(x, params, supports):
    """Pure-JAX mirror of OGCRNN.forward (inference mode)."""
    B, Cin, N, T = x.shape
    Wc = params["w_conv"]
    OUT, C = Wc.shape[0], Wc.shape[1]
    Wg = params["w_gcn"][:, :, 0]
    K = Wg.shape[1] // (Cin + C)

    mean = params["bn_mean"].reshape(1, Cin, 1, 1)
    var = params["bn_var"].reshape(1, Cin, 1, 1)
    xb = (x - mean) / jnp.sqrt(var + 1e-5)

    A = params["h_adj"] + supports[0]
    d = 1.0 / (jnp.sum(A, -1) + 1e-4)
    A = d[:, None] * A

    cheb = [jnp.eye(N, dtype=jnp.float32), A]
    for _ in range(2, K):
        cheb.append(2.0 * (A @ cheb[-1]) - cheb[-2])
    lap_t = jnp.transpose(jnp.stack(cheb, 0), (0, 2, 1))         # (K, N, N)

    h = jnp.zeros((B, C, N), jnp.float32)
    c = jnp.zeros((B, C, N), jnp.float32)
    outs = []
    for t in range(T):
        tem = jnp.concatenate([xb[:, :, :, t], h], axis=1)       # (B, Cin+C, N)
        z = jnp.einsum('bcn,knq->bckq', tem, lap_t)
        z = z.reshape(B, (Cin + C) * K, N)
        fea = jnp.einsum('oc,bcn->bon', Wg, z) + params["b_gcn"][None, :, None]
        i_g = fea[:, 0:C]
        j_g = fea[:, C:2 * C]
        f_g = fea[:, 2 * C:3 * C]
        o_g = fea[:, 3 * C:4 * C]
        c = c * jax.nn.sigmoid(f_g) + jax.nn.sigmoid(i_g) * jnp.tanh(j_g)
        h = jnp.tanh(c) * jax.nn.sigmoid(o_g)
        outs.append(h)
    hall = jnp.stack(outs, -1)                                   # (B, C, N, T)
    conv = (jnp.einsum('bcnt,oct->bon', hall, Wc[:, :, 0, :])
            + params["b_conv"][None, :, None])
    return conv[..., None], A


def init_params(key, *, num_nodes, in_dim=1, hidden=32, length=12, out_dim=12, K=3):
    """Deterministic synthetic parameters (PyTorch-style uniform init)."""
    ks = jax.random.split(key, 5)
    gcn_cin = K * (in_dim + hidden)
    s_g = 1.0 / math.sqrt(gcn_cin)                # Conv1d default bound
    s_c = 1.0 / math.sqrt(hidden * 1 * length)    # Conv2d default bound
    u = lambda k, shape, lo, hi: jax.random.uniform(k, shape, jnp.float32, lo, hi)
    return {
        "h_adj": u(ks[0], (num_nodes, num_nodes), 0.0, 1e-4),
        "w_gcn": u(ks[1], (4 * hidden, gcn_cin, 1), -s_g, s_g),
        "b_gcn": u(ks[2], (4 * hidden,), -s_g, s_g),
        "w_conv": u(ks[3], (out_dim, hidden, 1, length), -s_c, s_c),
        "b_conv": u(ks[4], (out_dim,), -s_c, s_c),
        "bn_mean": jnp.zeros((in_dim,), jnp.float32),
        "bn_var": jnp.ones((in_dim,), jnp.float32),
    }


if __name__ == "__main__":
    # Small shapes consistent with the module defaults:
    # batch=2, in_dim=1, num_nodes=16, length=12, dilation_channels=32, out_dim=12, K=3.
    B, Cin, N, T, C, OUT = 2, 1, 16, 12, 32, 12
    key = jax.random.PRNGKey(0)
    k_x, k_adj, k_p = jax.random.split(key, 3)
    x = jax.random.normal(k_x, (B, Cin, N, T), jnp.float32)
    supports = [jax.random.uniform(k_adj, (N, N), jnp.float32, 0.0, 1.0)]
    params = init_params(k_p, num_nodes=N, in_dim=Cin, hidden=C, length=T,
                         out_dim=OUT, K=3)

    conv_out, A_out1, A_out2 = ogcrnn_forward(x, params, supports)
    jax.block_until_ready((conv_out, A_out1, A_out2))

    # sanity check against the pure-JAX reference
    conv_ref, a_ref = reference_forward(x, params, supports)
    assert conv_out.shape == (B, OUT, N, 1)
    assert A_out1.shape == (N, N) and A_out2.shape == (N, N)
    assert jnp.allclose(conv_out, conv_ref, atol=2e-3, rtol=2e-3)
    assert jnp.allclose(A_out1, a_ref, atol=1e-5, rtol=1e-5)

    print("KERNEL_OK")
</pallas_src>

<mosaic_0001>
module attributes {stable_mosaic.version = 11 : i64} {
  func.func @ogcrnn_kernel(%arg0: i32, %arg1: memref<1x12x16x128xf32, #tpu.memory_space<vmem>>, %arg2: memref<32x16xf32, #tpu.memory_space<vmem>>, %arg3: memref<96x128xf32, #tpu.memory_space<vmem>>, %arg4: memref<384x128xf32, #tpu.memory_space<vmem>>, %arg5: memref<1x128xf32, #tpu.memory_space<vmem>>, %arg6: memref<1x16x128xf32, #tpu.memory_space<vmem>>, %arg7: memref<16x384xf32, #tpu.memory_space<vmem>>) attributes {dimension_semantics = [#tpu.dimension_semantics<parallel>], iteration_bounds = array<i64: 2>, scalar_prefetch = 0 : i64, scratch_operands = 1 : i64, tpu.core_type = #tpu.core_type<tc>, window_params = [{transform_indices = @transform_0, window_bounds = array<i64: 1, 12, 16, 128>}, {pipeline_mode = #tpu.pipeline_mode<synchronous>, transform_indices = @transform_1, window_bounds = array<i64: 32, 16>}, {pipeline_mode = #tpu.pipeline_mode<synchronous>, transform_indices = @transform_2, window_bounds = array<i64: 96, 128>}, {pipeline_mode = #tpu.pipeline_mode<synchronous>, transform_indices = @transform_3, window_bounds = array<i64: 384, 128>}, {pipeline_mode = #tpu.pipeline_mode<synchronous>, transform_indices = @transform_4, window_bounds = array<i64: 1, 128>}, {transform_indices = @transform_5, window_bounds = array<i64: 1, 16, 128>}]} {
    %c0 = arith.constant 0 : index
    %c0_0 = arith.constant 0 : index
    %0 = vector.load %arg2[%c0, %c0_0] : memref<32x16xf32, #tpu.memory_space<vmem>>, vector<32x16xf32>
    %c0_1 = arith.constant 0 : index
    %c0_2 = arith.constant 0 : index
    %1 = vector.load %arg3[%c0_1, %c0_2] : memref<96x128xf32, #tpu.memory_space<vmem>>, vector<32x128xf32>
    %c32 = arith.constant 32 : index
    %c0_3 = arith.constant 0 : index
    %2 = vector.load %arg3[%c32, %c0_3] : memref<96x128xf32, #tpu.memory_space<vmem>>, vector<32x128xf32>
    %c64 = arith.constant 64 : index
    %c0_4 = arith.constant 0 : index
    %3 = vector.load %arg3[%c64, %c0_4] : memref<96x128xf32, #tpu.memory_space<vmem>>, vector<32x128xf32>
    %cst = arith.constant 0.000000e+00 : f32
    %4 = vector.broadcast %cst : f32 to vector<16x32xf32>
    %cst_5 = arith.constant 0.000000e+00 : f32
    %5 = vector.broadcast %cst_5 : f32 to vector<16x32xf32>
    %cst_6 = arith.constant dense<0.000000e+00> : vector<32x32xf32>
    %6 = tpu.matmul %0, %4, %cst_6 {dimension_numbers = #tpu.dot_dimension_numbers<[1], [0], [0], [1], [0, 0, 1, 1], [], []>} : vector<32x16xf32>, vector<16x32xf32>, vector<32x32xf32> -> vector<32x32xf32>
    %c0_7 = arith.constant 0 : index
    %c0_8 = arith.constant 0 : index
    %c0_9 = arith.constant 0 : index
    %c0_10 = arith.constant 0 : index
    %7 = vector.load %arg1[%c0_7, %c0_8, %c0_9, %c0_10] : memref<1x12x16x128xf32, #tpu.memory_space<vmem>>, vector<1x1x16x128xf32>
    %8 = vector.shape_cast %7 : vector<1x1x16x128xf32> to vector<16x128xf32>
    %cst_11 = arith.constant dense<0.000000e+00> : vector<16x128xf32>
    %9 = tpu.matmul %4, %1, %cst_11 {dimension_numbers = #tpu.dot_dimension_numbers<[1], [0], [0], [1], [0, 0, 1, 1], [], []>} : vector<16x32xf32>, vector<32x128xf32>, vector<16x128xf32> -> vector<16x128xf32>
    %10 = arith.addf %8, %9 : vector<16x128xf32>
    %11 = vector.extract_strided_slice %6 {offsets = [0, 0], sizes = [16, 32], strides = [1, 1]} : vector<32x32xf32> to vector<16x32xf32>
    %cst_12 = arith.constant dense<0.000000e+00> : vector<16x128xf32>
    %12 = tpu.matmul %11, %2, %cst_12 {dimension_numbers = #tpu.dot_dimension_numbers<[1], [0], [0], [1], [0, 0, 1, 1], [], []>} : vector<16x32xf32>, vector<32x128xf32>, vector<16x128xf32> -> vector<16x128xf32>
    %13 = arith.addf %10, %12 : vector<16x128xf32>
    %14 = vector.extract_strided_slice %6 {offsets = [16, 0], sizes = [16, 32], strides = [1, 1]} : vector<32x32xf32> to vector<16x32xf32>
    %cst_13 = arith.constant dense<0.000000e+00> : vector<16x128xf32>
    %15 = tpu.matmul %14, %3, %cst_13 {dimension_numbers = #tpu.dot_dimension_numbers<[1], [0], [0], [1], [0, 0, 1, 1], [], []>} : vector<16x32xf32>, vector<32x128xf32>, vector<16x128xf32> -> vector<16x128xf32>
    %16 = arith.addf %13, %15 : vector<16x128xf32>
    %17 = arith.negf %16 : vector<16x128xf32>
    %18 = math.exp %17 : vector<16x128xf32>
    %cst_14 = arith.constant 1.000000e+00 : f32
    %19 = vector.broadcast %cst_14 : f32 to vector<16x128xf32>
    %20 = arith.addf %19, %18 : vector<16x128xf32>
    %21 = arith.divf %19, %20 : vector<16x128xf32>
    %22 = vector.extract_strided_slice %21 {offsets = [0, 0], sizes = [16, 32], strides = [1, 1]} : vector<16x128xf32> to vector<16x32xf32>
    %23 = vector.extract_strided_slice %21 {offsets = [0, 32], sizes = [16, 32], strides = [1, 1]} : vector<16x128xf32> to vector<16x32xf32>
    %cst_15 = arith.constant 2.000000e+00 : f32
    %24 = vector.broadcast %cst_15 : f32 to vector<16x32xf32>
    %25 = arith.mulf %24, %23 : vector<16x32xf32>
    %cst_16 = arith.constant 1.000000e+00 : f32
    %26 = vector.broadcast %cst_16 : f32 to vector<16x32xf32>
    %27 = arith.subf %25, %26 : vector<16x32xf32>
    %28 = vector.extract_strided_slice %21 {offsets = [0, 64], sizes = [16, 32], strides = [1, 1]} : vector<16x128xf32> to vector<16x32xf32>
    %29 = vector.extract_strided_slice %21 {offsets = [0, 96], sizes = [16, 32], strides = [1, 1]} : vector<16x128xf32> to vector<16x32xf32>
    %30 = arith.mulf %5, %28 : vector<16x32xf32>
    %31 = arith.mulf %22, %27 : vector<16x32xf32>
    %32 = arith.addf %30, %31 : vector<16x32xf32>
    %33 = math.tanh %32 : vector<16x32xf32>
    %34 = arith.mulf %33, %29 : vector<16x32xf32>
    %c0_17 = arith.constant 0 : index
    %c0_18 = arith.constant 0 : index
    %35 = vector.load %arg7[%c0_17, %c0_18] : memref<16x384xf32, #tpu.memory_space<vmem>>, vector<16x32xf32>
    tpu.vector_store %arg7[%c0_17, %c0_18], %34 {strides = array<i32>} : memref<16x384xf32, #tpu.memory_space<vmem>>, vector<16x32xf32>,
    %cst_19 = arith.constant dense<0.000000e+00> : vector<32x32xf32>
    %36 = tpu.matmul %0, %34, %cst_19 {dimension_numbers = #tpu.dot_dimension_numbers<[1], [0], [0], [1], [0, 0, 1, 1], [], []>} : vector<32x16xf32>, vector<16x32xf32>, vector<32x32xf32> -> vector<32x32xf32>
    %c0_20 = arith.constant 0 : index
    %c1 = arith.constant 1 : index
    %c0_21 = arith.constant 0 : index
    %c0_22 = arith.constant 0 : index
    %37 = vector.load %arg1[%c0_20, %c1, %c0_21, %c0_22] : memref<1x12x16x128xf32, #tpu.memory_space<vmem>>, vector<1x1x16x128xf32>
    %38 = vector.shape_cast %37 : vector<1x1x16x128xf32> to vector<16x128xf32>
    %cst_23 = arith.constant dense<0.000000e+00> : vector<16x128xf32>
    %39 = tpu.matmul %34, %1, %cst_23 {dimension_numbers = #tpu.dot_dimension_numbers<[1], [0], [0], [1], [0, 0, 1, 1], [], []>} : vector<16x32xf32>, vector<32x128xf32>, vector<16x128xf32> -> vector<16x128xf32>
    %40 = arith.addf %38, %39 : vector<16x128xf32>
    %41 = vector.extract_strided_slice %36 {offsets = [0, 0], sizes = [16, 32], strides = [1, 1]} : vector<32x32xf32> to vector<16x32xf32>
    %cst_24 = arith.constant dense<0.000000e+00> : vector<16x128xf32>
    %42 = tpu.matmul %41, %2, %cst_24 {dimension_numbers = #tpu.dot_dimension_numbers<[1], [0], [0], [1], [0, 0, 1, 1], [], []>} : vector<16x32xf32>, vector<32x128xf32>, vector<16x128xf32> -> vector<16x128xf32>
    %43 = arith.addf %40, %42 : vector<16x128xf32>
    %44 = vector.extract_strided_slice %36 {offsets = [16, 0], sizes = [16, 32], strides = [1, 1]} : vector<32x32xf32> to vector<16x32xf32>
    %cst_25 = arith.constant dense<0.000000e+00> : vector<16x128xf32>
    %45 = tpu.matmul %44, %3, %cst_25 {dimension_numbers = #tpu.dot_dimension_numbers<[1], [0], [0], [1], [0, 0, 1, 1], [], []>} : vector<16x32xf32>, vector<32x128xf32>, vector<16x128xf32> -> vector<16x128xf32>
    %46 = arith.addf %43, %45 : vector<16x128xf32>
    %47 = arith.negf %46 : vector<16x128xf32>
    %48 = math.exp %47 : vector<16x128xf32>
    %cst_26 = arith.constant 1.000000e+00 : f32
    %49 = vector.broadcast %cst_26 : f32 to vector<16x128xf32>
    %50 = arith.addf %49, %48 : vector<16x128xf32>
    %51 = arith.divf %49, %50 : vector<16x128xf32>
    %52 = vector.extract_strided_slice %51 {offsets = [0, 0], sizes = [16, 32], strides = [1, 1]} : vector<16x128xf32> to vector<16x32xf32>
    %53 = vector.extract_strided_slice %51 {offsets = [0, 32], sizes = [16, 32], strides = [1, 1]} : vector<16x128xf32> to vector<16x32xf32>
    %cst_27 = arith.constant 2.000000e+00 : f32
    %54 = vector.broadcast %cst_27 : f32 to vector<16x32xf32>
    %55 = arith.mulf %54, %53 : vector<16x32xf32>
    %cst_28 = arith.constant 1.000000e+00 : f32
    %56 = vector.broadcast %cst_28 : f32 to vector<16x32xf32>
    %57 = arith.subf %55, %56 : vector<16x32xf32>
    %58 = vector.extract_strided_slice %51 {offsets = [0, 64], sizes = [16, 32], strides = [1, 1]} : vector<16x128xf32> to vector<16x32xf32>
    %59 = vector.extract_strided_slice %51 {offsets = [0, 96], sizes = [16, 32], strides = [1, 1]} : vector<16x128xf32> to vector<16x32xf32>
    %60 = arith.mulf %32, %58 : vector<16x32xf32>
    %61 = arith.mulf %52, %57 : vector<16x32xf32>
    %62 = arith.addf %60, %61 : vector<16x32xf32>
    %63 = math.tanh %62 : vector<16x32xf32>
    %64 = arith.mulf %63, %59 : vector<16x32xf32>
    %c0_29 = arith.constant 0 : index
    %c32_30 = arith.constant 32 : index
    %65 = vector.load %arg7[%c0_29, %c32_30] : memref<16x384xf32, #tpu.memory_space<vmem>>, vector<16x32xf32>
    tpu.vector_store %arg7[%c0_29, %c32_30], %64 {strides = array<i32>} : memref<16x384xf32, #tpu.memory_space<vmem>>, vector<16x32xf32>,
    %cst_31 = arith.constant dense<0.000000e+00> : vector<32x32xf32>
    %66 = tpu.matmul %0, %64, %cst_31 {dimension_numbers = #tpu.dot_dimension_numbers<[1], [0], [0], [1], [0, 0, 1, 1], [], []>} : vector<32x16xf32>, vector<16x32xf32>, vector<32x32xf32> -> vector<32x32xf32>
    %c0_32 = arith.constant 0 : index
    %c2 = arith.constant 2 : index
    %c0_33 = arith.constant 0 : index
    %c0_34 = arith.constant 0 : index
    %67 = vector.load %arg1[%c0_32, %c2, %c0_33, %c0_34] : memref<1x12x16x128xf32, #tpu.memory_space<vmem>>, vector<1x1x16x128xf32>
    %68 = vector.shape_cast %67 : vector<1x1x16x128xf32> to vector<16x128xf32>
    %cst_35 = arith.constant dense<0.000000e+00> : vector<16x128xf32>
    %69 = tpu.matmul %64, %1, %cst_35 {dimension_numbers = #tpu.dot_dimension_numbers<[1], [0], [0], [1], [0, 0, 1, 1], [], []>} : vector<16x32xf32>, vector<32x128xf32>, vector<16x128xf32> -> vector<16x128xf32>
    %70 = arith.addf %68, %69 : vector<16x128xf32>
    %71 = vector.extract_strided_slice %66 {offsets = [0, 0], sizes = [16, 32], strides = [1, 1]} : vector<32x32xf32> to vector<16x32xf32>
    %cst_36 = arith.constant dense<0.000000e+00> : vector<16x128xf32>
    %72 = tpu.matmul %71, %2, %cst_36 {dimension_numbers = #tpu.dot_dimension_numbers<[1], [0], [0], [1], [0, 0, 1, 1], [], []>} : vector<16x32xf32>, vector<32x128xf32>, vector<16x128xf32> -> vector<16x128xf32>
    %73 = arith.addf %70, %72 : vector<16x128xf32>
    %74 = vector.extract_strided_slice %66 {offsets = [16, 0], sizes = [16, 32], strides = [1, 1]} : vector<32x32xf32> to vector<16x32xf32>
    %cst_37 = arith.constant dense<0.000000e+00> : vector<16x128xf32>
    %75 = tpu.matmul %74, %3, %cst_37 {dimension_numbers = #tpu.dot_dimension_numbers<[1], [0], [0], [1], [0, 0, 1, 1], [], []>} : vector<16x32xf32>, vector<32x128xf32>, vector<16x128xf32> -> vector<16x128xf32>
    %76 = arith.addf %73, %75 : vector<16x128xf32>
    %77 = arith.negf %76 : vector<16x128xf32>
    %78 = math.exp %77 : vector<16x128xf32>
    %cst_38 = arith.constant 1.000000e+00 : f32
    %79 = vector.broadcast %cst_38 : f32 to vector<16x128xf32>
    %80 = arith.addf %79, %78 : vector<16x128xf32>
    %81 = arith.divf %79, %80 : vector<16x128xf32>
    %82 = vector.extract_strided_slice %81 {offsets = [0, 0], sizes = [16, 32], strides = [1, 1]} : vector<16x128xf32> to vector<16x32xf32>
    %83 = vector.extract_strided_slice %81 {offsets = [0, 32], sizes = [16, 32], strides = [1, 1]} : vector<16x128xf32> to vector<16x32xf32>
    %cst_39 = arith.constant 2.000000e+00 : f32
    %84 = vector.broadcast %cst_39 : f32 to vector<16x32xf32>
    %85 = arith.mulf %84, %83 : vector<16x32xf32>
    %cst_40 = arith.constant 1.000000e+00 : f32
    %86 = vector.broadcast %cst_40 : f32 to vector<16x32xf32>
    %87 = arith.subf %85, %86 : vector<16x32xf32>
    %88 = vector.extract_strided_slice %81 {offsets = [0, 64], sizes = [16, 32], strides = [1, 1]} : vector<16x128xf32> to vector<16x32xf32>
    %89 = vector.extract_strided_slice %81 {offsets = [0, 96], sizes = [16, 32], strides = [1, 1]} : vector<16x128xf32> to vector<16x32xf32>
    %90 = arith.mulf %62, %88 : vector<16x32xf32>
    %91 = arith.mulf %82, %87 : vector<16x32xf32>
    %92 = arith.addf %90, %91 : vector<16x32xf32>
    %93 = math.tanh %92 : vector<16x32xf32>
    %94 = arith.mulf %93, %89 : vector<16x32xf32>
    %c0_41 = arith.constant 0 : index
    %c64_42 = arith.constant 64 : index
    %95 = vector.load %arg7[%c0_41, %c64_42] : memref<16x384xf32, #tpu.memory_space<vmem>>, vector<16x32xf32>
    tpu.vector_store %arg7[%c0_41, %c64_42], %94 {strides = array<i32>} : memref<16x384xf32, #tpu.memory_space<vmem>>, vector<16x32xf32>,
    %cst_43 = arith.constant dense<0.000000e+00> : vector<32x32xf32>
    %96 = tpu.matmul %0, %94, %cst_43 {dimension_numbers = #tpu.dot_dimension_numbers<[1], [0], [0], [1], [0, 0, 1, 1], [], []>} : vector<32x16xf32>, vector<16x32xf32>, vector<32x32xf32> -> vector<32x32xf32>
    %c0_44 = arith.constant 0 : index
    %c3 = arith.constant 3 : index
    %c0_45 = arith.constant 0 : index
    %c0_46 = arith.constant 0 : index
    %97 = vector.load %arg1[%c0_44, %c3, %c0_45, %c0_46] : memref<1x12x16x128xf32, #tpu.memory_space<vmem>>, vector<1x1x16x128xf32>
    %98 = vector.shape_cast %97 : vector<1x1x16x128xf32> to vector<16x128xf32>
    %cst_47 = arith.constant dense<0.000000e+00> : vector<16x128xf32>
    %99 = tpu.matmul %94, %1, %cst_47 {dimension_numbers = #tpu.dot_dimension_numbers<[1], [0], [0], [1], [0, 0, 1, 1], [], []>} : vector<16x32xf32>, vector<32x128xf32>, vector<16x128xf32> -> vector<16x128xf32>
    %100 = arith.addf %98, %99 : vector<16x128xf32>
    %101 = vector.extract_strided_slice %96 {offsets = [0, 0], sizes = [16, 32], strides = [1, 1]} : vector<32x32xf32> to vector<16x32xf32>
    %cst_48 = arith.constant dense<0.000000e+00> : vector<16x128xf32>
    %102 = tpu.matmul %101, %2, %cst_48 {dimension_numbers = #tpu.dot_dimension_numbers<[1], [0], [0], [1], [0, 0, 1, 1], [], []>} : vector<16x32xf32>, vector<32x128xf32>, vector<16x128xf32> -> vector<16x128xf32>
    %103 = arith.addf %100, %102 : vector<16x128xf32>
    %104 = vector.extract_strided_slice %96 {offsets = [16, 0], sizes = [16, 32], strides = [1, 1]} : vector<32x32xf32> to vector<16x32xf32>
    %cst_49 = arith.constant dense<0.000000e+00> : vector<16x128xf32>
    %105 = tpu.matmul %104, %3, %cst_49 {dimension_numbers = #tpu.dot_dimension_numbers<[1], [0], [0], [1], [0, 0, 1, 1], [], []>} : vector<16x32xf32>, vector<32x128xf32>, vector<16x128xf32> -> vector<16x128xf32>
    %106 = arith.addf %103, %105 : vector<16x128xf32>
    %107 = arith.negf %106 : vector<16x128xf32>
    %108 = math.exp %107 : vector<16x128xf32>
    %cst_50 = arith.constant 1.000000e+00 : f32
    %109 = vector.broadcast %cst_50 : f32 to vector<16x128xf32>
    %110 = arith.addf %109, %108 : vector<16x128xf32>
    %111 = arith.divf %109, %110 : vector<16x128xf32>
    %112 = vector.extract_strided_slice %111 {offsets = [0, 0], sizes = [16, 32], strides = [1, 1]} : vector<16x128xf32> to vector<16x32xf32>
    %113 = vector.extract_strided_slice %111 {offsets = [0, 32], sizes = [16, 32], strides = [1, 1]} : vector<16x128xf32> to vector<16x32xf32>
    %cst_51 = arith.constant 2.000000e+00 : f32
    %114 = vector.broadcast %cst_51 : f32 to vector<16x32xf32>
    %115 = arith.mulf %114, %113 : vector<16x32xf32>
    %cst_52 = arith.constant 1.000000e+00 : f32
    %116 = vector.broadcast %cst_52 : f32 to vector<16x32xf32>
    %117 = arith.subf %115, %116 : vector<16x32xf32>
    %118 = vector.extract_strided_slice %111 {offsets = [0, 64], sizes = [16, 32], strides = [1, 1]} : vector<16x128xf32> to vector<16x32xf32>
    %119 = vector.extract_strided_slice %111 {offsets = [0, 96], sizes = [16, 32], strides = [1, 1]} : vector<16x128xf32> to vector<16x32xf32>
    %120 = arith.mulf %92, %118 : vector<16x32xf32>
    %121 = arith.mulf %112, %117 : vector<16x32xf32>
    %122 = arith.addf %120, %121 : vector<16x32xf32>
    %123 = math.tanh %122 : vector<16x32xf32>
    %124 = arith.mulf %123, %119 : vector<16x32xf32>
    %c0_53 = arith.constant 0 : index
    %c96 = arith.constant 96 : index
    %125 = vector.load %arg7[%c0_53, %c96] : memref<16x384xf32, #tpu.memory_space<vmem>>, vector<16x32xf32>
    tpu.vector_store %arg7[%c0_53, %c96], %124 {strides = array<i32>} : memref<16x384xf32, #tpu.memory_space<vmem>>, vector<16x32xf32>,
    %cst_54 = arith.constant dense<0.000000e+00> : vector<32x32xf32>
    %126 = tpu.matmul %0, %124, %cst_54 {dimension_numbers = #tpu.dot_dimension_numbers<[1], [0], [0], [1], [0, 0, 1, 1], [], []>} : vector<32x16xf32>, vector<16x32xf32>, vector<32x32xf32> -> vector<32x32xf32>
    %c0_55 = arith.constant 0 : index
    %c4 = arith.constant 4 : index
    %c0_56 = arith.constant 0 : index
    %c0_57 = arith.constant 0 : index
    %127 = vector.load %arg1[%c0_55, %c4, %c0_56, %c0_57] : memref<1x12x16x128xf32, #tpu.memory_space<vmem>>, vector<1x1x16x128xf32>
    %128 = vector.shape_cast %127 : vector<1x1x16x128xf32> to vector<16x128xf32>
    %cst_58 = arith.constant dense<0.000000e+00> : vector<16x128xf32>
    %129 = tpu.matmul %124, %1, %cst_58 {dimension_numbers = #tpu.dot_dimension_numbers<[1], [0], [0], [1], [0, 0, 1, 1], [], []>} : vector<16x32xf32>, vector<32x128xf32>, vector<16x128xf32> -> vector<16x128xf32>
    %130 = arith.addf %128, %129 : vector<16x128xf32>
    %131 = vector.extract_strided_slice %126 {offsets = [0, 0], sizes = [16, 32], strides = [1, 1]} : vector<32x32xf32> to vector<16x32xf32>
    %cst_59 = arith.constant dense<0.000000e+00> : vector<16x128xf32>
    %132 = tpu.matmul %131, %2, %cst_59 {dimension_numbers = #tpu.dot_dimension_numbers<[1], [0], [0], [1], [0, 0, 1, 1], [], []>} : vector<16x32xf32>, vector<32x128xf32>, vector<16x128xf32> -> vector<16x128xf32>
    %133 = arith.addf %130, %132 : vector<16x128xf32>
    %134 = vector.extract_strided_slice %126 {offsets = [16, 0], sizes = [16, 32], strides = [1, 1]} : vector<32x32xf32> to vector<16x32xf32>
    %cst_60 = arith.constant dense<0.000000e+00> : vector<16x128xf32>
    %135 = tpu.matmul %134, %3, %cst_60 {dimension_numbers = #tpu.dot_dimension_numbers<[1], [0], [0], [1], [0, 0, 1, 1], [], []>} : vector<16x32xf32>, vector<32x128xf32>, vector<16x128xf32> -> vector<16x128xf32>
    %136 = arith.addf %133, %135 : vector<16x128xf32>
    %137 = arith.negf %136 : vector<16x128xf32>
    %138 = math.exp %137 : vector<16x128xf32>
    %cst_61 = arith.constant 1.000000e+00 : f32
    %139 = vector.broadcast %cst_61 : f32 to vector<16x128xf32>
    %140 = arith.addf %139, %138 : vector<16x128xf32>
    %141 = arith.divf %139, %140 : vector<16x128xf32>
    %142 = vector.extract_strided_slice %141 {offsets = [0, 0], sizes = [16, 32], strides = [1, 1]} : vector<16x128xf32> to vector<16x32xf32>
    %143 = vector.extract_strided_slice %141 {offsets = [0, 32], sizes = [16, 32], strides = [1, 1]} : vector<16x128xf32> to vector<16x32xf32>
    %cst_62 = arith.constant 2.000000e+00 : f32
    %144 = vector.broadcast %cst_62 : f32 to vector<16x32xf32>
    %145 = arith.mulf %144, %143 : vector<16x32xf32>
    %cst_63 = arith.constant 1.000000e+00 : f32
    %146 = vector.broadcast %cst_63 : f32 to vector<16x32xf32>
    %147 = arith.subf %145, %146 : vector<16x32xf32>
    %148 = vector.extract_strided_slice %141 {offsets = [0, 64], sizes = [16, 32], strides = [1, 1]} : vector<16x128xf32> to vector<16x32xf32>
    %149 = vector.extract_strided_slice %141 {offsets = [0, 96], sizes = [16, 32], strides = [1, 1]} : vector<16x128xf32> to vector<16x32xf32>
    %150 = arith.mulf %122, %148 : vector<16x32xf32>
    %151 = arith.mulf %142, %147 : vector<16x32xf32>
    %152 = arith.addf %150, %151 : vector<16x32xf32>
    %153 = math.tanh %152 : vector<16x32xf32>
    %154 = arith.mulf %153, %149 : vector<16x32xf32>
    %c0_64 = arith.constant 0 : index
    %c128 = arith.constant 128 : index
    %155 = vector.load %arg7[%c0_64, %c128] : memref<16x384xf32, #tpu.memory_space<vmem>>, vector<16x32xf32>
    tpu.vector_store %arg7[%c0_64, %c128], %154 {strides = array<i32>} : memref<16x384xf32, #tpu.memory_space<vmem>>, vector<16x32xf32>,
    %cst_65 = arith.constant dense<0.000000e+00> : vector<32x32xf32>
    %156 = tpu.matmul %0, %154, %cst_65 {dimension_numbers = #tpu.dot_dimension_numbers<[1], [0], [0], [1], [0, 0, 1, 1], [], []>} : vector<32x16xf32>, vector<16x32xf32>, vector<32x32xf32> -> vector<32x32xf32>
    %c0_66 = arith.constant 0 : index
    %c5 = arith.constant 5 : index
    %c0_67 = arith.constant 0 : index
    %c0_68 = arith.constant 0 : index
    %157 = vector.load %arg1[%c0_66, %c5, %c0_67, %c0_68] : memref<1x12x16x128xf32, #tpu.memory_space<vmem>>, vector<1x1x16x128xf32>
    %158 = vector.shape_cast %157 : vector<1x1x16x128xf32> to vector<16x128xf32>
    %cst_69 = arith.constant dense<0.000000e+00> : vector<16x128xf32>
    %159 = tpu.matmul %154, %1, %cst_69 {dimension_numbers = #tpu.dot_dimension_numbers<[1], [0], [0], [1], [0, 0, 1, 1], [], []>} : vector<16x32xf32>, vector<32x128xf32>, vector<16x128xf32> -> vector<16x128xf32>
    %160 = arith.addf %158, %159 : vector<16x128xf32>
    %161 = vector.extract_strided_slice %156 {offsets = [0, 0], sizes = [16, 32], strides = [1, 1]} : vector<32x32xf32> to vector<16x32xf32>
    %cst_70 = arith.constant dense<0.000000e+00> : vector<16x128xf32>
    %162 = tpu.matmul %161, %2, %cst_70 {dimension_numbers = #tpu.dot_dimension_numbers<[1], [0], [0], [1], [0, 0, 1, 1], [], []>} : vector<16x32xf32>, vector<32x128xf32>, vector<16x128xf32> -> vector<16x128xf32>
    %163 = arith.addf %160, %162 : vector<16x128xf32>
    %164 = vector.extract_strided_slice %156 {offsets = [16, 0], sizes = [16, 32], strides = [1, 1]} : vector<32x32xf32> to vector<16x32xf32>
    %cst_71 = arith.constant dense<0.000000e+00> : vector<16x128xf32>
    %165 = tpu.matmul %164, %3, %cst_71 {dimension_numbers = #tpu.dot_dimension_numbers<[1], [0], [0], [1], [0, 0, 1, 1], [], []>} : vector<16x32xf32>, vector<32x128xf32>, vector<16x128xf32> -> vector<16x128xf32>
    %166 = arith.addf %163, %165 : vector<16x128xf32>
    %167 = arith.negf %166 : vector<16x128xf32>
    %168 = math.exp %167 : vector<16x128xf32>
    %cst_72 = arith.constant 1.000000e+00 : f32
    %169 = vector.broadcast %cst_72 : f32 to vector<16x128xf32>
    %170 = arith.addf %169, %168 : vector<16x128xf32>
    %171 = arith.divf %169, %170 : vector<16x128xf32>
    %172 = vector.extract_strided_slice %171 {offsets = [0, 0], sizes = [16, 32], strides = [1, 1]} : vector<16x128xf32> to vector<16x32xf32>
    %173 = vector.extract_strided_slice %171 {offsets = [0, 32], sizes = [16, 32], strides = [1, 1]} : vector<16x128xf32> to vector<16x32xf32>
    %cst_73 = arith.constant 2.000000e+00 : f32
    %174 = vector.broadcast %cst_73 : f32 to vector<16x32xf32>
    %175 = arith.mulf %174, %173 : vector<16x32xf32>
    %cst_74 = arith.constant 1.000000e+00 : f32
    %176 = vector.broadcast %cst_74 : f32 to vector<16x32xf32>
    %177 = arith.subf %175, %176 : vector<16x32xf32>
    %178 = vector.extract_strided_slice %171 {offsets = [0, 64], sizes = [16, 32], strides = [1, 1]} : vector<16x128xf32> to vector<16x32xf32>
    %179 = vector.extract_strided_slice %171 {offsets = [0, 96], sizes = [16, 32], strides = [1, 1]} : vector<16x128xf32> to vector<16x32xf32>
    %180 = arith.mulf %152, %178 : vector<16x32xf32>
    %181 = arith.mulf %172, %177 : vector<16x32xf32>
    %182 = arith.addf %180, %181 : vector<16x32xf32>
    %183 = math.tanh %182 : vector<16x32xf32>
    %184 = arith.mulf %183, %179 : vector<16x32xf32>
    %c0_75 = arith.constant 0 : index
    %c160 = arith.constant 160 : index
    %185 = vector.load %arg7[%c0_75, %c160] : memref<16x384xf32, #tpu.memory_space<vmem>>, vector<16x32xf32>
    tpu.vector_store %arg7[%c0_75, %c160], %184 {strides = array<i32>} : memref<16x384xf32, #tpu.memory_space<vmem>>, vector<16x32xf32>,
    %cst_76 = arith.constant dense<0.000000e+00> : vector<32x32xf32>
    %186 = tpu.matmul %0, %184, %cst_76 {dimension_numbers = #tpu.dot_dimension_numbers<[1], [0], [0], [1], [0, 0, 1, 1], [], []>} : vector<32x16xf32>, vector<16x32xf32>, vector<32x32xf32> -> vector<32x32xf32>
    %c0_77 = arith.constant 0 : index
    %c6 = arith.constant 6 : index
    %c0_78 = arith.constant 0 : index
    %c0_79 = arith.constant 0 : index
    %187 = vector.load %arg1[%c0_77, %c6, %c0_78, %c0_79] : memref<1x12x16x128xf32, #tpu.memory_space<vmem>>, vector<1x1x16x128xf32>
    %188 = vector.shape_cast %187 : vector<1x1x16x128xf32> to vector<16x128xf32>
    %cst_80 = arith.constant dense<0.000000e+00> : vector<16x128xf32>
    %189 = tpu.matmul %184, %1, %cst_80 {dimension_numbers = #tpu.dot_dimension_numbers<[1], [0], [0], [1], [0, 0, 1, 1], [], []>} : vector<16x32xf32>, vector<32x128xf32>, vector<16x128xf32> -> vector<16x128xf32>
    %190 = arith.addf %188, %189 : vector<16x128xf32>
    %191 = vector.extract_strided_slice %186 {offsets = [0, 0], sizes = [16, 32], strides = [1, 1]} : vector<32x32xf32> to vector<16x32xf32>
    %cst_81 = arith.constant dense<0.000000e+00> : vector<16x128xf32>
    %192 = tpu.matmul %191, %2, %cst_81 {dimension_numbers = #tpu.dot_dimension_numbers<[1], [0], [0], [1], [0, 0, 1, 1], [], []>} : vector<16x32xf32>, vector<32x128xf32>, vector<16x128xf32> -> vector<16x128xf32>
    %193 = arith.addf %190, %192 : vector<16x128xf32>
    %194 = vector.extract_strided_slice %186 {offsets = [16, 0], sizes = [16, 32], strides = [1, 1]} : vector<32x32xf32> to vector<16x32xf32>
    %cst_82 = arith.constant dense<0.000000e+00> : vector<16x128xf32>
    %195 = tpu.matmul %194, %3, %cst_82 {dimension_numbers = #tpu.dot_dimension_numbers<[1], [0], [0], [1], [0, 0, 1, 1], [], []>} : vector<16x32xf32>, vector<32x128xf32>, vector<16x128xf32> -> vector<16x128xf32>
    %196 = arith.addf %193, %195 : vector<16x128xf32>
    %197 = arith.negf %196 : vector<16x128xf32>
    %198 = math.exp %197 : vector<16x128xf32>
    %cst_83 = arith.constant 1.000000e+00 : f32
    %199 = vector.broadcast %cst_83 : f32 to vector<16x128xf32>
    %200 = arith.addf %199, %198 : vector<16x128xf32>
    %201 = arith.divf %199, %200 : vector<16x128xf32>
    %202 = vector.extract_strided_slice %201 {offsets = [0, 0], sizes = [16, 32], strides = [1, 1]} : vector<16x128xf32> to vector<16x32xf32>
    %203 = vector.extract_strided_slice %201 {offsets = [0, 32], sizes = [16, 32], strides = [1, 1]} : vector<16x128xf32> to vector<16x32xf32>
    %cst_84 = arith.constant 2.000000e+00 : f32
    %204 = vector.broadcast %cst_84 : f32 to vector<16x32xf32>
    %205 = arith.mulf %204, %203 : vector<16x32xf32>
    %cst_85 = arith.constant 1.000000e+00 : f32
    %206 = vector.broadcast %cst_85 : f32 to vector<16x32xf32>
    %207 = arith.subf %205, %206 : vector<16x32xf32>
    %208 = vector.extract_strided_slice %201 {offsets = [0, 64], sizes = [16, 32], strides = [1, 1]} : vector<16x128xf32> to vector<16x32xf32>
    %209 = vector.extract_strided_slice %201 {offsets = [0, 96], sizes = [16, 32], strides = [1, 1]} : vector<16x128xf32> to vector<16x32xf32>
    %210 = arith.mulf %182, %208 : vector<16x32xf32>
    %211 = arith.mulf %202, %207 : vector<16x32xf32>
    %212 = arith.addf %210, %211 : vector<16x32xf32>
    %213 = math.tanh %212 : vector<16x32xf32>
    %214 = arith.mulf %213, %209 : vector<16x32xf32>
    %c0_86 = arith.constant 0 : index
    %c192 = arith.constant 192 : index
    %215 = vector.load %arg7[%c0_86, %c192] : memref<16x384xf32, #tpu.memory_space<vmem>>, vector<16x32xf32>
    tpu.vector_store %arg7[%c0_86, %c192], %214 {strides = array<i32>} : memref<16x384xf32, #tpu.memory_space<vmem>>, vector<16x32xf32>,
    %cst_87 = arith.constant dense<0.000000e+00> : vector<32x32xf32>
    %216 = tpu.matmul %0, %214, %cst_87 {dimension_numbers = #tpu.dot_dimension_numbers<[1], [0], [0], [1], [0, 0, 1, 1], [], []>} : vector<32x16xf32>, vector<16x32xf32>, vector<32x32xf32> -> vector<32x32xf32>
    %c0_88 = arith.constant 0 : index
    %c7 = arith.constant 7 : index
    %c0_89 = arith.constant 0 : index
    %c0_90 = arith.constant 0 : index
    %217 = vector.load %arg1[%c0_88, %c7, %c0_89, %c0_90] : memref<1x12x16x128xf32, #tpu.memory_space<vmem>>, vector<1x1x16x128xf32>
    %218 = vector.shape_cast %217 : vector<1x1x16x128xf32> to vector<16x128xf32>
    %cst_91 = arith.constant dense<0.000000e+00> : vector<16x128xf32>
    %219 = tpu.matmul %214, %1, %cst_91 {dimension_numbers = #tpu.dot_dimension_numbers<[1], [0], [0], [1], [0, 0, 1, 1], [], []>} : vector<16x32xf32>, vector<32x128xf32>, vector<16x128xf32> -> vector<16x128xf32>
    %220 = arith.addf %218, %219 : vector<16x128xf32>
    %221 = vector.extract_strided_slice %216 {offsets = [0, 0], sizes = [16, 32], strides = [1, 1]} : vector<32x32xf32> to vector<16x32xf32>
    %cst_92 = arith.constant dense<0.000000e+00> : vector<16x128xf32>
    %222 = tpu.matmul %221, %2, %cst_92 {dimension_numbers = #tpu.dot_dimension_numbers<[1], [0], [0], [1], [0, 0, 1, 1], [], []>} : vector<16x32xf32>, vector<32x128xf32>, vector<16x128xf32> -> vector<16x128xf32>
    %223 = arith.addf %220, %222 : vector<16x128xf32>
    %224 = vector.extract_strided_slice %216 {offsets = [16, 0], sizes = [16, 32], strides = [1, 1]} : vector<32x32xf32> to vector<16x32xf32>
    %cst_93 = arith.constant dense<0.000000e+00> : vector<16x128xf32>
    %225 = tpu.matmul %224, %3, %cst_93 {dimension_numbers = #tpu.dot_dimension_numbers<[1], [0], [0], [1], [0, 0, 1, 1], [], []>} : vector<16x32xf32>, vector<32x128xf32>, vector<16x128xf32> -> vector<16x128xf32>
    %226 = arith.addf %223, %225 : vector<16x128xf32>
    %227 = arith.negf %226 : vector<16x128xf32>
    %228 = math.exp %227 : vector<16x128xf32>
    %cst_94 = arith.constant 1.000000e+00 : f32
    %229 = vector.broadcast %cst_94 : f32 to vector<16x128xf32>
    %230 = arith.addf %229, %228 : vector<16x128xf32>
    %231 = arith.divf %229, %230 : vector<16x128xf32>
    %232 = vector.extract_strided_slice %231 {offsets = [0, 0], sizes = [16, 32], strides = [1, 1]} : vector<16x128xf32> to vector<16x32xf32>
    %233 = vector.extract_strided_slice %231 {offsets = [0, 32], sizes = [16, 32], strides = [1, 1]} : vector<16x128xf32> to vector<16x32xf32>
    %cst_95 = arith.constant 2.000000e+00 : f32
    %234 = vector.broadcast %cst_95 : f32 to vector<16x32xf32>
    %235 = arith.mulf %234, %233 : vector<16x32xf32>
    %cst_96 = arith.constant 1.000000e+00 : f32
    %236 = vector.broadcast %cst_96 : f32 to vector<16x32xf32>
    %237 = arith.subf %235, %236 : vector<16x32xf32>
    %238 = vector.extract_strided_slice %231 {offsets = [0, 64], sizes = [16, 32], strides = [1, 1]} : vector<16x128xf32> to vector<16x32xf32>
    %239 = vector.extract_strided_slice %231 {offsets = [0, 96], sizes = [16, 32], strides = [1, 1]} : vector<16x128xf32> to vector<16x32xf32>
    %240 = arith.mulf %212, %238 : vector<16x32xf32>
    %241 = arith.mulf %232, %237 : vector<16x32xf32>
    %242 = arith.addf %240, %241 : vector<16x32xf32>
    %243 = math.tanh %242 : vector<16x32xf32>
    %244 = arith.mulf %243, %239 : vector<16x32xf32>
    %c0_97 = arith.constant 0 : index
    %c224 = arith.constant 224 : index
    %245 = vector.load %arg7[%c0_97, %c224] : memref<16x384xf32, #tpu.memory_space<vmem>>, vector<16x32xf32>
    tpu.vector_store %arg7[%c0_97, %c224], %244 {strides = array<i32>} : memref<16x384xf32, #tpu.memory_space<vmem>>, vector<16x32xf32>,
    %cst_98 = arith.constant dense<0.000000e+00> : vector<32x32xf32>
    %246 = tpu.matmul %0, %244, %cst_98 {dimension_numbers = #tpu.dot_dimension_numbers<[1], [0], [0], [1], [0, 0, 1, 1], [], []>} : vector<32x16xf32>, vector<16x32xf32>, vector<32x32xf32> -> vector<32x32xf32>
    %c0_99 = arith.constant 0 : index
    %c8 = arith.constant 8 : index
    %c0_100 = arith.constant 0 : index
    %c0_101 = arith.constant 0 : index
    %247 = vector.load %arg1[%c0_99, %c8, %c0_100, %c0_101] : memref<1x12x16x128xf32, #tpu.memory_space<vmem>>, vector<1x1x16x128xf32>
    %248 = vector.shape_cast %247 : vector<1x1x16x128xf32> to vector<16x128xf32>
    %cst_102 = arith.constant dense<0.000000e+00> : vector<16x128xf32>
    %249 = tpu.matmul %244, %1, %cst_102 {dimension_numbers = #tpu.dot_dimension_numbers<[1], [0], [0], [1], [0, 0, 1, 1], [], []>} : vector<16x32xf32>, vector<32x128xf32>, vector<16x128xf32> -> vector<16x128xf32>
    %250 = arith.addf %248, %249 : vector<16x128xf32>
    %251 = vector.extract_strided_slice %246 {offsets = [0, 0], sizes = [16, 32], strides = [1, 1]} : vector<32x32xf32> to vector<16x32xf32>
    %cst_103 = arith.constant dense<0.000000e+00> : vector<16x128xf32>
    %252 = tpu.matmul %251, %2, %cst_103 {dimension_numbers = #tpu.dot_dimension_numbers<[1], [0], [0], [1], [0, 0, 1, 1], [], []>} : vector<16x32xf32>, vector<32x128xf32>, vector<16x128xf32> -> vector<16x128xf32>
    %253 = arith.addf %250, %252 : vector<16x128xf32>
    %254 = vector.extract_strided_slice %246 {offsets = [16, 0], sizes = [16, 32], strides = [1, 1]} : vector<32x32xf32> to vector<16x32xf32>
    %cst_104 = arith.constant dense<0.000000e+00> : vector<16x128xf32>
    %255 = tpu.matmul %254, %3, %cst_104 {dimension_numbers = #tpu.dot_dimension_numbers<[1], [0], [0], [1], [0, 0, 1, 1], [], []>} : vector<16x32xf32>, vector<32x128xf32>, vector<16x128xf32> -> vector<16x128xf32>
    %256 = arith.addf %253, %255 : vector<16x128xf32>
    %257 = arith.negf %256 : vector<16x128xf32>
    %258 = math.exp %257 : vector<16x128xf32>
    %cst_105 = arith.constant 1.000000e+00 : f32
    %259 = vector.broadcast %cst_105 : f32 to vector<16x128xf32>
    %260 = arith.addf %259, %258 : vector<16x128xf32>
    %261 = arith.divf %259, %260 : vector<16x128xf32>
    %262 = vector.extract_strided_slice %261 {offsets = [0, 0], sizes = [16, 32], strides = [1, 1]} : vector<16x128xf32> to vector<16x32xf32>
    %263 = vector.extract_strided_slice %261 {offsets = [0, 32], sizes = [16, 32], strides = [1, 1]} : vector<16x128xf32> to vector<16x32xf32>
    %cst_106 = arith.constant 2.000000e+00 : f32
    %264 = vector.broadcast %cst_106 : f32 to vector<16x32xf32>
    %265 = arith.mulf %264, %263 : vector<16x32xf32>
    %cst_107 = arith.constant 1.000000e+00 : f32
    %266 = vector.broadcast %cst_107 : f32 to vector<16x32xf32>
    %267 = arith.subf %265, %266 : vector<16x32xf32>
    %268 = vector.extract_strided_slice %261 {offsets = [0, 64], sizes = [16, 32], strides = [1, 1]} : vector<16x128xf32> to vector<16x32xf32>
    %269 = vector.extract_strided_slice %261 {offsets = [0, 96], sizes = [16, 32], strides = [1, 1]} : vector<16x128xf32> to vector<16x32xf32>
    %270 = arith.mulf %242, %268 : vector<16x32xf32>
    %271 = arith.mulf %262, %267 : vector<16x32xf32>
    %272 = arith.addf %270, %271 : vector<16x32xf32>
    %273 = math.tanh %272 : vector<16x32xf32>
    %274 = arith.mulf %273, %269 : vector<16x32xf32>
    %c0_108 = arith.constant 0 : index
    %c256 = arith.constant 256 : index
    %275 = vector.load %arg7[%c0_108, %c256] : memref<16x384xf32, #tpu.memory_space<vmem>>, vector<16x32xf32>
    tpu.vector_store %arg7[%c0_108, %c256], %274 {strides = array<i32>} : memref<16x384xf32, #tpu.memory_space<vmem>>, vector<16x32xf32>,
    %cst_109 = arith.constant dense<0.000000e+00> : vector<32x32xf32>
    %276 = tpu.matmul %0, %274, %cst_109 {dimension_numbers = #tpu.dot_dimension_numbers<[1], [0], [0], [1], [0, 0, 1, 1], [], []>} : vector<32x16xf32>, vector<16x32xf32>, vector<32x32xf32> -> vector<32x32xf32>
    %c0_110 = arith.constant 0 : index
    %c9 = arith.constant 9 : index
    %c0_111 = arith.constant 0 : index
    %c0_112 = arith.constant 0 : index
    %277 = vector.load %arg1[%c0_110, %c9, %c0_111, %c0_112] : memref<1x12x16x128xf32, #tpu.memory_space<vmem>>, vector<1x1x16x128xf32>
    %278 = vector.shape_cast %277 : vector<1x1x16x128xf32> to vector<16x128xf32>
    %cst_113 = arith.constant dense<0.000000e+00> : vector<16x128xf32>
    %279 = tpu.matmul %274, %1, %cst_113 {dimension_numbers = #tpu.dot_dimension_numbers<[1], [0], [0], [1], [0, 0, 1, 1], [], []>} : vector<16x32xf32>, vector<32x128xf32>, vector<16x128xf32> -> vector<16x128xf32>
    %280 = arith.addf %278, %279 : vector<16x128xf32>
    %281 = vector.extract_strided_slice %276 {offsets = [0, 0], sizes = [16, 32], strides = [1, 1]} : vector<32x32xf32> to vector<16x32xf32>
    %cst_114 = arith.constant dense<0.000000e+00> : vector<16x128xf32>
    %282 = tpu.matmul %281, %2, %cst_114 {dimension_numbers = #tpu.dot_dimension_numbers<[1], [0], [0], [1], [0, 0, 1, 1], [], []>} : vector<16x32xf32>, vector<32x128xf32>, vector<16x128xf32> -> vector<16x128xf32>
    %283 = arith.addf %280, %282 : vector<16x128xf32>
    %284 = vector.extract_strided_slice %276 {offsets = [16, 0], sizes = [16, 32], strides = [1, 1]} : vector<32x32xf32> to vector<16x32xf32>
    %cst_115 = arith.constant dense<0.000000e+00> : vector<16x128xf32>
    %285 = tpu.matmul %284, %3, %cst_115 {dimension_numbers = #tpu.dot_dimension_numbers<[1], [0], [0], [1], [0, 0, 1, 1], [], []>} : vector<16x32xf32>, vector<32x128xf32>, vector<16x128xf32> -> vector<16x128xf32>
    %286 = arith.addf %283, %285 : vector<16x128xf32>
    %287 = arith.negf %286 : vector<16x128xf32>
    %288 = math.exp %287 : vector<16x128xf32>
    %cst_116 = arith.constant 1.000000e+00 : f32
    %289 = vector.broadcast %cst_116 : f32 to vector<16x128xf32>
    %290 = arith.addf %289, %288 : vector<16x128xf32>
    %291 = arith.divf %289, %290 : vector<16x128xf32>
    %292 = vector.extract_strided_slice %291 {offsets = [0, 0], sizes = [16, 32], strides = [1, 1]} : vector<16x128xf32> to vector<16x32xf32>
    %293 = vector.extract_strided_slice %291 {offsets = [0, 32], sizes = [16, 32], strides = [1, 1]} : vector<16x128xf32> to vector<16x32xf32>
    %cst_117 = arith.constant 2.000000e+00 : f32
    %294 = vector.broadcast %cst_117 : f32 to vector<16x32xf32>
    %295 = arith.mulf %294, %293 : vector<16x32xf32>
    %cst_118 = arith.constant 1.000000e+00 : f32
    %296 = vector.broadcast %cst_118 : f32 to vector<16x32xf32>
    %297 = arith.subf %295, %296 : vector<16x32xf32>
    %298 = vector.extract_strided_slice %291 {offsets = [0, 64], sizes = [16, 32], strides = [1, 1]} : vector<16x128xf32> to vector<16x32xf32>
    %299 = vector.extract_strided_slice %291 {offsets = [0, 96], sizes = [16, 32], strides = [1, 1]} : vector<16x128xf32> to vector<16x32xf32>
    %300 = arith.mulf %272, %298 : vector<16x32xf32>
    %301 = arith.mulf %292, %297 : vector<16x32xf32>
    %302 = arith.addf %300, %301 : vector<16x32xf32>
    %303 = math.tanh %302 : vector<16x32xf32>
    %304 = arith.mulf %303, %299 : vector<16x32xf32>
    %c0_119 = arith.constant 0 : index
    %c288 = arith.constant 288 : index
    %305 = vector.load %arg7[%c0_119, %c288] : memref<16x384xf32, #tpu.memory_space<vmem>>, vector<16x32xf32>
    tpu.vector_store %arg7[%c0_119, %c288], %304 {strides = array<i32>} : memref<16x384xf32, #tpu.memory_space<vmem>>, vector<16x32xf32>,
    %cst_120 = arith.constant dense<0.000000e+00> : vector<32x32xf32>
    %306 = tpu.matmul %0, %304, %cst_120 {dimension_numbers = #tpu.dot_dimension_numbers<[1], [0], [0], [1], [0, 0, 1, 1], [], []>} : vector<32x16xf32>, vector<16x32xf32>, vector<32x32xf32> -> vector<32x32xf32>
    %c0_121 = arith.constant 0 : index
    %c10 = arith.constant 10 : index
    %c0_122 = arith.constant 0 : index
    %c0_123 = arith.constant 0 : index
    %307 = vector.load %arg1[%c0_121, %c10, %c0_122, %c0_123] : memref<1x12x16x128xf32, #tpu.memory_space<vmem>>, vector<1x1x16x128xf32>
    %308 = vector.shape_cast %307 : vector<1x1x16x128xf32> to vector<16x128xf32>
    %cst_124 = arith.constant dense<0.000000e+00> : vector<16x128xf32>
    %309 = tpu.matmul %304, %1, %cst_124 {dimension_numbers = #tpu.dot_dimension_numbers<[1], [0], [0], [1], [0, 0, 1, 1], [], []>} : vector<16x32xf32>, vector<32x128xf32>, vector<16x128xf32> -> vector<16x128xf32>
    %310 = arith.addf %308, %309 : vector<16x128xf32>
    %311 = vector.extract_strided_slice %306 {offsets = [0, 0], sizes = [16, 32], strides = [1, 1]} : vector<32x32xf32> to vector<16x32xf32>
    %cst_125 = arith.constant dense<0.000000e+00> : vector<16x128xf32>
    %312 = tpu.matmul %311, %2, %cst_125 {dimension_numbers = #tpu.dot_dimension_numbers<[1], [0], [0], [1], [0, 0, 1, 1], [], []>} : vector<16x32xf32>, vector<32x128xf32>, vector<16x128xf32> -> vector<16x128xf32>
    %313 = arith.addf %310, %312 : vector<16x128xf32>
    %314 = vector.extract_strided_slice %306 {offsets = [16, 0], sizes = [16, 32], strides = [1, 1]} : vector<32x32xf32> to vector<16x32xf32>
    %cst_126 = arith.constant dense<0.000000e+00> : vector<16x128xf32>
    %315 = tpu.matmul %314, %3, %cst_126 {dimension_numbers = #tpu.dot_dimension_numbers<[1], [0], [0], [1], [0, 0, 1, 1], [], []>} : vector<16x32xf32>, vector<32x128xf32>, vector<16x128xf32> -> vector<16x128xf32>
    %316 = arith.addf %313, %315 : vector<16x128xf32>
    %317 = arith.negf %316 : vector<16x128xf32>
    %318 = math.exp %317 : vector<16x128xf32>
    %cst_127 = arith.constant 1.000000e+00 : f32
    %319 = vector.broadcast %cst_127 : f32 to vector<16x128xf32>
    %320 = arith.addf %319, %318 : vector<16x128xf32>
    %321 = arith.divf %319, %320 : vector<16x128xf32>
    %322 = vector.extract_strided_slice %321 {offsets = [0, 0], sizes = [16, 32], strides = [1, 1]} : vector<16x128xf32> to vector<16x32xf32>
    %323 = vector.extract_strided_slice %321 {offsets = [0, 32], sizes = [16, 32], strides = [1, 1]} : vector<16x128xf32> to vector<16x32xf32>
    %cst_128 = arith.constant 2.000000e+00 : f32
    %324 = vector.broadcast %cst_128 : f32 to vector<16x32xf32>
    %325 = arith.mulf %324, %323 : vector<16x32xf32>
    %cst_129 = arith.constant 1.000000e+00 : f32
    %326 = vector.broadcast %cst_129 : f32 to vector<16x32xf32>
    %327 = arith.subf %325, %326 : vector<16x32xf32>
    %328 = vector.extract_strided_slice %321 {offsets = [0, 64], sizes = [16, 32], strides = [1, 1]} : vector<16x128xf32> to vector<16x32xf32>
    %329 = vector.extract_strided_slice %321 {offsets = [0, 96], sizes = [16, 32], strides = [1, 1]} : vector<16x128xf32> to vector<16x32xf32>
    %330 = arith.mulf %302, %328 : vector<16x32xf32>
    %331 = arith.mulf %322, %327 : vector<16x32xf32>
    %332 = arith.addf %330, %331 : vector<16x32xf32>
    %333 = math.tanh %332 : vector<16x32xf32>
    %334 = arith.mulf %333, %329 : vector<16x32xf32>
    %c0_130 = arith.constant 0 : index
    %c320 = arith.constant 320 : index
    %335 = vector.load %arg7[%c0_130, %c320] : memref<16x384xf32, #tpu.memory_space<vmem>>, vector<16x32xf32>
    tpu.vector_store %arg7[%c0_130, %c320], %334 {strides = array<i32>} : memref<16x384xf32, #tpu.memory_space<vmem>>, vector<16x32xf32>,
    %cst_131 = arith.constant dense<0.000000e+00> : vector<32x32xf32>
    %336 = tpu.matmul %0, %334, %cst_131 {dimension_numbers = #tpu.dot_dimension_numbers<[1], [0], [0], [1], [0, 0, 1, 1], [], []>} : vector<32x16xf32>, vector<16x32xf32>, vector<32x32xf32> -> vector<32x32xf32>
    %c0_132 = arith.constant 0 : index
    %c11 = arith.constant 11 : index
    %c0_133 = arith.constant 0 : index
    %c0_134 = arith.constant 0 : index
    %337 = vector.load %arg1[%c0_132, %c11, %c0_133, %c0_134] : memref<1x12x16x128xf32, #tpu.memory_space<vmem>>, vector<1x1x16x128xf32>
    %338 = vector.shape_cast %337 : vector<1x1x16x128xf32> to vector<16x128xf32>
    %cst_135 = arith.constant dense<0.000000e+00> : vector<16x128xf32>
    %339 = tpu.matmul %334, %1, %cst_135 {dimension_numbers = #tpu.dot_dimension_numbers<[1], [0], [0], [1], [0, 0, 1, 1], [], []>} : vector<16x32xf32>, vector<32x128xf32>, vector<16x128xf32> -> vector<16x128xf32>
    %340 = arith.addf %338, %339 : vector<16x128xf32>
    %341 = vector.extract_strided_slice %336 {offsets = [0, 0], sizes = [16, 32], strides = [1, 1]} : vector<32x32xf32> to vector<16x32xf32>
    %cst_136 = arith.constant dense<0.000000e+00> : vector<16x128xf32>
    %342 = tpu.matmul %341, %2, %cst_136 {dimension_numbers = #tpu.dot_dimension_numbers<[1], [0], [0], [1], [0, 0, 1, 1], [], []>} : vector<16x32xf32>, vector<32x128xf32>, vector<16x128xf32> -> vector<16x128xf32>
    %343 = arith.addf %340, %342 : vector<16x128xf32>
    %344 = vector.extract_strided_slice %336 {offsets = [16, 0], sizes = [16, 32], strides = [1, 1]} : vector<32x32xf32> to vector<16x32xf32>
    %cst_137 = arith.constant dense<0.000000e+00> : vector<16x128xf32>
    %345 = tpu.matmul %344, %3, %cst_137 {dimension_numbers = #tpu.dot_dimension_numbers<[1], [0], [0], [1], [0, 0, 1, 1], [], []>} : vector<16x32xf32>, vector<32x128xf32>, vector<16x128xf32> -> vector<16x128xf32>
    %346 = arith.addf %343, %345 : vector<16x128xf32>
    %347 = arith.negf %346 : vector<16x128xf32>
    %348 = math.exp %347 : vector<16x128xf32>
    %cst_138 = arith.constant 1.000000e+00 : f32
    %349 = vector.broadcast %cst_138 : f32 to vector<16x128xf32>
    %350 = arith.addf %349, %348 : vector<16x128xf32>
    %351 = arith.divf %349, %350 : vector<16x128xf32>
    %352 = vector.extract_strided_slice %351 {offsets = [0, 0], sizes = [16, 32], strides = [1, 1]} : vector<16x128xf32> to vector<16x32xf32>
    %353 = vector.extract_strided_slice %351 {offsets = [0, 32], sizes = [16, 32], strides = [1, 1]} : vector<16x128xf32> to vector<16x32xf32>
    %cst_139 = arith.constant 2.000000e+00 : f32
    %354 = vector.broadcast %cst_139 : f32 to vector<16x32xf32>
    %355 = arith.mulf %354, %353 : vector<16x32xf32>
    %cst_140 = arith.constant 1.000000e+00 : f32
    %356 = vector.broadcast %cst_140 : f32 to vector<16x32xf32>
    %357 = arith.subf %355, %356 : vector<16x32xf32>
    %358 = vector.extract_strided_slice %351 {offsets = [0, 64], sizes = [16, 32], strides = [1, 1]} : vector<16x128xf32> to vector<16x32xf32>
    %359 = vector.extract_strided_slice %351 {offsets = [0, 96], sizes = [16, 32], strides = [1, 1]} : vector<16x128xf32> to vector<16x32xf32>
    %360 = arith.mulf %332, %358 : vector<16x32xf32>
    %361 = arith.mulf %352, %357 : vector<16x32xf32>
    %362 = arith.addf %360, %361 : vector<16x32xf32>
    %363 = math.tanh %362 : vector<16x32xf32>
    %364 = arith.mulf %363, %359 : vector<16x32xf32>
    %c0_141 = arith.constant 0 : index
    %c352 = arith.constant 352 : index
    %365 = vector.load %arg7[%c0_141, %c352] : memref<16x384xf32, #tpu.memory_space<vmem>>, vector<16x32xf32>
    tpu.vector_store %arg7[%c0_141, %c352], %364 {strides = array<i32>} : memref<16x384xf32, #tpu.memory_space<vmem>>, vector<16x32xf32>,
    %c0_142 = arith.constant 0 : index
    %c0_143 = arith.constant 0 : index
    %366 = vector.load %arg7[%c0_142, %c0_143] : memref<16x384xf32, #tpu.memory_space<vmem>>, vector<16x384xf32>
    %c0_144 = arith.constant 0 : index
    %c0_145 = arith.constant 0 : index
    %367 = vector.load %arg4[%c0_144, %c0_145] : memref<384x128xf32, #tpu.memory_space<vmem>>, vector<384x128xf32>
    %cst_146 = arith.constant dense<0.000000e+00> : vector<16x128xf32>
    %368 = tpu.matmul %366, %367, %cst_146 {dimension_numbers = #tpu.dot_dimension_numbers<[1], [0], [0], [1], [0, 0, 1, 1], [], []>} : vector<16x384xf32>, vector<384x128xf32>, vector<16x128xf32> -> vector<16x128xf32>
    %c0_147 = arith.constant 0 : index
    %c0_148 = arith.constant 0 : index
    %369 = vector.load %arg5[%c0_147, %c0_148] : memref<1x128xf32, #tpu.memory_space<vmem>>, vector<1x128xf32>
    %370 = vector.broadcast %369 : vector<1x128xf32> to vector<16x128xf32>
    %371 = arith.addf %368, %370 : vector<16x128xf32>
    %c0_149 = arith.constant 0 : index
    %c0_150 = arith.constant 0 : index
    %c0_151 = arith.constant 0 : index
    %372 = vector.load %arg6[%c0_149, %c0_150, %c0_151] : memref<1x16x128xf32, #tpu.memory_space<vmem>>, vector<1x16x128xf32>
    %373 = vector.shape_cast %372 : vector<1x16x128xf32> to vector<16x128xf32>
    %374 = vector.shape_cast %371 : vector<16x128xf32> to vector<1x16x128xf32>
    tpu.vector_store %arg6[%c0_149, %c0_150, %c0_151], %374 {strides = array<i32>} : memref<1x16x128xf32, #tpu.memory_space<vmem>>, vector<1x16x128xf32>,
    return
  }
  func.func @transform_0(%arg0: i32) -> (i32, i32, i32, i32) {
    %c0_i32 = arith.constant 0 : i32
    %c0_i32_0 = arith.constant 0 : i32
    %c0_i32_1 = arith.constant 0 : i32
    %c0_i32_2 = arith.constant 0 : i32
    return %arg0, %c0_i32, %c0_i32_0, %c0_i32_1 : i32, i32, i32, i32
  }
  func.func @transform_1(%arg0: i32) -> (i32, i32) {
    %c0_i32 = arith.constant 0 : i32
    %c0_i32_0 = arith.constant 0 : i32
    %c0_i32_1 = arith.constant 0 : i32
    return %c0_i32, %c0_i32_0 : i32, i32
  }
  func.func @transform_2(%arg0: i32) -> (i32, i32) {
    %c0_i32 = arith.constant 0 : i32
    %c0_i32_0 = arith.constant 0 : i32
    %c0_i32_1 = arith.constant 0 : i32
    return %c0_i32, %c0_i32_0 : i32, i32
  }
  func.func @transform_3(%arg0: i32) -> (i32, i32) {
    %c0_i32 = arith.constant 0 : i32
    %c0_i32_0 = arith.constant 0 : i32
    %c0_i32_1 = arith.constant 0 : i32
    return %c0_i32, %c0_i32_0 : i32, i32
  }
  func.func @transform_4(%arg0: i32) -> (i32, i32) {
    %c0_i32 = arith.constant 0 : i32
    %c0_i32_0 = arith.constant 0 : i32
    %c0_i32_1 = arith.constant 0 : i32
    return %c0_i32, %c0_i32_0 : i32, i32
  }
  func.func @transform_5(%arg0: i32) -> (i32, i32, i32) {
    %c0_i32 = arith.constant 0 : i32
    %c0_i32_0 = arith.constant 0 : i32
    %c0_i32_1 = arith.constant 0 : i32
    return %arg0, %c0_i32, %c0_i32_0 : i32, i32, i32
  }
}

</mosaic_0001>

<bundles_post_ra>
// kernel: ogcrnn_forward.1
= control target key start
LH: loop header
LB: loop body
LE: loop exit
PB: predicated region body
PF: predicated region fallthrough
CT: control target
= control target key end

     0   :  { %s7057_s18 = smov 0   ;;  %s7947_s0 = inlined_call_operand.vmem [shape: f32[2,12,16,128], index: 0, kind: input, shape index: {}]   ;;  %s7948_s1 = inlined_call_operand.vmem [shape: f32[32,16], index: 1, kind: input, shape index: {}]   ;;  %s7949_s2 = inlined_call_operand.vmem [shape: f32[96,128], index: 2, kind: input, shape index: {}]   ;;  %s7950_s3 = inlined_call_operand.vmem [shape: f32[384,128], index: 3, kind: input, shape index: {}]   ;;  %s7951_s4 = inlined_call_operand.vmem [shape: f32[1,128], index: 4, kind: input, shape index: {}]   ;;  %s7952_s5 = inlined_call_operand.vmem [shape: f32[2,16,128], index: 5, kind: output, shape index: {}]  }
   0x1 LB: > { %s5294_s19 = sadd.s32 4294967295, %s7021_s18   ;;  %p5298_p0 = scmp.ge.s32.totalorder %s7021_s18, 1  ;;  %s7021_s18 = sphi %s7057_s18, %s15_s18  }
   0x2   : > { %p187_p1 = scmp.lt.s32.totalorder %s7021_s18, 3 }
   0x4   : > { %p188_p2 = pnand %p5298_p0, %p187_p1 }
   0x5   : > { %v7068_v0 = vld [vmem:[%s7948_s1] sm:$0xff] (!%p188_p2)  ;;  %vm241_vm0 = vcmask (!%p188_p2), 130048   ;;  %v7073_v1 = vld [vmem:[%s7948_s1 + $0x8] sm:$0xff] (!%p188_p2)  ;;  %v7023_v2 = vmov (!%p188_p2), 0.0   ;;  %v7080_v3 = vld [vmem:[%s7948_s1 + $0x10] sm:$0xff] (!%p188_p2)  ;;  %vm341_vm1 = vcmask (!%p188_p2), 261120  }
   0x6   : > { %191 = sbr.rel (%p188_p2) target bundleno = 10251 (0x280b), region = 40  ;;  %5837 = vmatprep.subr.mxu1 (!%p188_p2), %v7023_v2  ;;  %5839 = vmatprep.mubr.msk.f32.mxu1 (!%p188_p2), %vm241_vm0, %v7068_v0  ;;  %v229_v4 = vld [vmem:[%s7949_s2] sm:$0xff] (!%p188_p2)  ;;  %v230_v5 = vld [vmem:[%s7949_s2 + $0x8] sm:$0xff] (!%p188_p2)  ;;  %v231_v7 = vld [vmem:[%s7949_s2 + $0x10] sm:$0xff] (!%p188_p2)  ;;  %p215_p3 = scmp.lt.s32.totalorder (!%p188_p2), %s5294_s19, 1  ;;  %vm1041_vm2 = vcmask (!%p188_p2), 523520  }
   0x7   : > { %5838 = vmatpush3.msra.mxu1 (!%p188_p2), %v7023_v2  ;;  %v7088_v6 = vpack.c.bf16 (!%p188_p2), %v230_v5, %v229_v4  ;;  %v232_v8 = vld [vmem:[%s7949_s2 + $0x18] sm:$0xff] (!%p188_p2)  ;;  %5882 = vmatprep.mubr.msk.f32.mxu0 (!%p188_p2), %vm241_vm0, %v7068_v0  ;;  %v233_v10 = vld [vmem:[%s7949_s2 + $0x20] sm:$0xff] (!%p188_p2)  ;;  %v234_v11 = vld [vmem:[%s7949_s2 + $0x28] sm:$0xff] (!%p188_p2)  ;;  %s7024_s8 = smov (!%p188_p2), 96   ;;  %s7025_s9 = smov (!%p188_p2), 64   ;;  %vm1435_vm3 = vcmask (!%p188_p2), 785920  }
   0x8   : > { %5840 = vmatmul.mubr.msk.f32.vlgmr.msra.gmra.mrb[0].mxu1 (!%p188_p2), %vm241_vm0, %v7073_v1  ;;  %v7100_v9 = vpack.c.bf16 (!%p188_p2), %v232_v8, %v231_v7  ;;  %v7113_v12 = vld [vmem:[%s7948_s1 + $0x18] sm:$0xff] (!%p188_p2)  ;;  %v7118_v13 = vpack.c.bf16 (!%p188_p2), %v234_v11, %v233_v10  ;;  %v235_v14 = vld [vmem:[%s7949_s2 + $0x30] sm:$0xff] (!%p188_p2)  ;;  %v237_v17 = vld [vmem:[%s7949_s2 + $0x40] sm:$0xff] (!%p188_p2)  ;;  %vm1839_vm4 = vcmask (!%p188_p2), 1048320  }
   0x9   : > { %5842 = vmatprep.mubr.msk.f32.mxu1 (!%p188_p2), %vm241_vm0, %v7080_v3  ;;  %6387 = vmatprep.subr.bf16.mxu1 (!%p188_p2), %v7088_v6  ;;  %v236_v15 = vld [vmem:[%s7949_s2 + $0x38] sm:$0xff] (!%p188_p2)  ;;  %v238_v18 = vld [vmem:[%s7949_s2 + $0x48] sm:$0xff] (!%p188_p2)  ;;  %v239_v20 = vld [vmem:[%s7949_s2 + $0x50] sm:$0xff] (!%p188_p2) }
   0xa   : > { %6389 = vmatpush3.bf16.msra.mxu1 (!%p188_p2), %v7088_v6  ;;  %v7130_v16 = vpack.c.bf16 (!%p188_p2), %v236_v15, %v235_v14  ;;  %v7141_v19 = vpack.c.bf16 (!%p188_p2), %v238_v18, %v237_v17  ;;  %v240_v21 = vld [vmem:[%s7949_s2 + $0x58] sm:$0xff] (!%p188_p2) }
   0xb   : > { %6391 = vmatprep.subr.bf16.mxu1 (!%p188_p2), %v7100_v9  ;;  %v7150_v24 = vpack.c.bf16 (!%p188_p2), %v240_v21, %v239_v20 }
   0xc   : > { %5843 = vmatmul.mubr.msk.f32.gmra.mrb[2].mxu1 (!%p188_p2), %vm241_vm0, %v7113_v12 }
   0xd   : > { %5853 = vmatprep.mubr.f32.mxu1 %v7023_v2  ;;  %s7954_s19 = smov (!%p215_p3, %s5294_s19), 1 }
   0xe   : > { %6393 = vmatpush3.bf16.msra.mxu1 %v7100_v9  ;;  %s6854_s29 = smul.u32 192, %s7954_s19 }
   0xf   : > { %6395 = vmatprep.subr.bf16.mxu1 %v7118_v13 }
  0x10   : > { %s7171_s7 = scalar_lea.vmem %s7947_s0, %s6854_s29 }
  0x11   : > { %5854 = vmatmul.mubr.f32.vlgmr.msra.gmra.mrb[4].mxu1 %v7023_v2  ;;  %v340_v27 = vld [vmem:[%s7171_s7 + $0x8] sm:$0xff]  ;;  %v339_v28 = vld [vmem:[%s7171_s7] sm:$0xff]  ;;  %v5319_v8 = vld [vmem:[%s7171_s7 + $0x18] sm:$0xff] }
  0x12   : > { %6397 = vmatpush3.bf16.msra.mxu1 %v7118_v13  ;;  %v5318_v10 = vld [vmem:[%s7171_s7 + $0x10] sm:$0xff] }
  0x13   : > { %6399 = vmatprep.subr.bf16.mxu1 %v7130_v16 }
  0x16   : > { %6401 = vmatpush3.bf16.msra.mxu1 %v7130_v16 }
  0x17   : > { %6403 = vmatprep.subr.bf16.mxu1 %v7141_v19 }
  0xdb   : > { %v5841_v22 = vpop.f32.mrb[0].mxu1 }
  0xdc   : > { %v320_v23 = vpop.f32.mrb[1].mxu1 }
  0xdd   : > { %5864 = vmatprep.mubr.msk.f32.mxu1 %vm341_vm1, %v320_v23 }
  0xde   : > { %5865 = vmatmul.mubr.msk.f32.vlgmr.msra.gmra.mrb[4].mxu1 %vm341_vm1, %v5841_v22 }
  0xdf   : > { %6405 = vmatpush3.bf16.msra.mxu1 %v7141_v19  ;;  %v5844_v25 = vpop.f32.mrb[2].mxu1 }
  0xe0   : > { %6407 = vmatprep.subr.bf16.mxu1 %v7150_v24  ;;  %v330_v26 = vpop.f32.mrb[3].mxu1 }
  0xe1   : > { %5875 = vmatprep.mubr.msk.f32.mxu1 %vm341_vm1, %v330_v26 }
  0xe3   : > { %6409 = vmatpush3.bf16.msra.mxu1 %v7150_v24 }
  0xe6   : > { %5876 = vmatmul.mubr.msk.f32.vlgmr.msra.gmra.mrb[4].mxu1 %vm341_vm1, %v5844_v25 }
  0xe7   : > { %5925 = vmatprep.mubr.msk.f32.mxu1 %vm241_vm0, %v7068_v0 }
 0x1b9   : > { %v5877_v29 = vpop.f32.mrb[4].mxu1 }
 0x1ba   : > { %v6782_v30 = vadd.f32 %v5877_v29, %v340_v27  ;;  %v577_v31 = vpop.f32.mrb[5].mxu1 }
 0x1bb   : > { %v6783_v32 = vadd.f32 %v577_v31, %v339_v28 }
 0x1bc   : > { %v5311_v33 = vmul.f32 -1.442695, %v6782_v30 }
 0x1bd   : > { %v5310_v34 = vmul.f32 -1.442695, %v6783_v32 }
 0x1be   : > { %6867 = vpow2.f32 %v5311_v33 }
 0x1bf   : > { %6869 = vpow2.f32 %v5310_v34 }
 0x1c8   : > { %v6868_v35 = vpop.eup %6867 }
 0x1c9   : > { %v6870_v36 = vpop.eup %6869  ;;  %v595_v37 = vadd.f32 1.0, %v6868_v35 }
 0x1ca   : > { %v594_v38 = vadd.f32 1.0, %v6870_v36 }
 0x1cb   : > { %6871 = vrcp.f32 %v595_v37 }
 0x1cc   : > { %6873 = vrcp.f32 %v594_v38 }
 0x1d5   : > { %v6872_v39 = vpop.eup %6871 }
 0x1d6   : > { %v6874_v40 = vpop.eup %6873  ;;  %v601_v43 = vmul.f32 2.0, %v6872_v39  ;;  %v605_v52 = vmul.f32 0.0, %v6872_v39 }
 0x1d7   : > { %v600_v41 = vmul.f32 2.0, %v6874_v40  ;;  %v604_v49 = vmul.f32 0.0, %v6874_v40 }
 0x1d8   : > { %v5313_v44 = vadd.f32 -1.0, %v601_v43 }
 0x1d9   : > { %v5312_v42 = vadd.f32 -1.0, %v600_v41 }
 0x1db   : > { %608 = vrot.lane.b32.xlu0 %v5312_v42, %s7024_s8 }
 0x1df   : > { %610 = vrot.lane.b32.xlu0 %v5313_v44, %s7024_s8 }
 0x1e3   : > { %630 = vrot.lane.b32.xlu0 %v6874_v40, %s7024_s8 }
 0x24d   : > { %v609_v45 = vpop.permute.xlu0 %608 }
 0x24e   : > { %v614_v46 = vmul.f32 %v6874_v40, %v609_v45 }
 0x250   : > { %618 = vrot.lane.b32.xlu1 %v614_v46, %s7025_s9 }
 0x251   : > { %v611_v47 = vpop.permute.xlu0 %610 }
 0x252   : > { %v615_v48 = vmul.f32 %v6872_v39, %v611_v47 }
 0x254   : > { %620 = vrot.lane.b32.xlu1 %v615_v48, %s7025_s9 }
 0x255   : > { %v631_v56 = vpop.permute.xlu0 %630 }
 0x258   : > { %632 = vrot.lane.b32.xlu1 %v6872_v39, %s7024_s8 }
 0x2c2   : > { %v619_v50 = vpop.permute.xlu1 %618 }
 0x2c3   : > { %v7181_v51 = vadd.f32 %v619_v50, %v604_v49 }
 0x2c5   : > { %6875 = vtanh.f32 %v7181_v51 }
 0x2c6   : > { %v621_v53 = vpop.permute.xlu1 %620 }
 0x2c7   : > { %v7184_v54 = vadd.f32 %v621_v53, %v605_v52 }
 0x2c9   : > { %6877 = vtanh.f32 %v7184_v54 }
 0x2ca   : > { %v633_v59 = vpop.permute.xlu1 %632 }
 0x2cf   : > { %v6876_v55 = vpop.eup %6875 }
 0x2d0   : > { %v636_v57 = vmul.f32 %v6876_v55, %v631_v56  ;;  %v5335_v55 = vld [vmem:[%s7171_s7 + $0x28] sm:$0xff]  ;;  %v5334_v56 = vld [vmem:[%s7171_s7 + $0x20] sm:$0xff] }
 0x2d2   : > { %640 = vrot.lane.b32.xlu0 %v636_v57, %s7025_s9 }
 0x2d3   : > { %v6878_v58 = vpop.eup %6877 }
 0x2d4   : > { %v637_v60 = vmul.f32 %v6878_v58, %v633_v59 }
 0x2d6   : > { %642 = vrot.lane.b32.xlu1 %v637_v60, %s7025_s9 }
 0x344   : > { %v641_v61 = vpop.permute.xlu0 %640 }
 0x345   : > { %646 = vst.msk [vmem:[#allocation2] sm:$0xff] %vm341_vm1, %v641_v61 }
 0x348   : > { %v643_v62 = vpop.permute.xlu1 %642 }
 0x349   : > { %647 = vst.msk [vmem:[#allocation2 + $0x18] sm:$0xff] %vm341_vm1, %v643_v62  ;;  %v6410_v63 = vpack.c.bf16 %v643_v62, %v641_v61 }
 0x34b   : > { %6411 = vmatprep.subr.bf16.mxu0 %v6410_v63 }
 0x34c   : > { %6413 = vmatpush3.bf16.msra.mxu0 %v6410_v63 }
 0x34d   : > { %6415 = vmatprep.subr.bf16.mxu0 %v7088_v6 }
 0x34f   : > { %5883 = vmatmul.mubr.msk.f32.vlgmr.msra.gmra.mrb[0].mxu0 %vm241_vm0, %v7073_v1 }
 0x350   : > { %6417 = vmatpush3.bf16.msra.mxu0 %v7088_v6  ;;  %5885 = vmatprep.mubr.msk.f32.mxu0 %vm241_vm0, %v7080_v3 }
 0x351   : > { %6419 = vmatprep.subr.bf16.mxu0 %v7100_v9 }
 0x353   : > { %5886 = vmatmul.mubr.msk.f32.gmra.mrb[2].mxu0 %vm241_vm0, %v7113_v12 }
 0x354   : > { %6421 = vmatpush3.bf16.msra.mxu0 %v7100_v9  ;;  %5896 = vmatprep.mubr.msk.f32.mxu0 %vm341_vm1, %v641_v61 }
 0x355   : > { %6423 = vmatprep.subr.bf16.mxu0 %v7118_v13 }
 0x357   : > { %5897 = vmatmul.mubr.msk.f32.vlgmr.msra.gmra.mrb[4].mxu0 %vm341_vm1, %v643_v62 }
 0x358   : > { %6425 = vmatpush3.bf16.msra.mxu0 %v7118_v13 }
 0x359   : > { %6427 = vmatprep.subr.bf16.mxu0 %v7130_v16 }
 0x35c   : > { %6429 = vmatpush3.bf16.msra.mxu0 %v7130_v16 }
 0x35d   : > { %6431 = vmatprep.subr.bf16.mxu0 %v7141_v19 }
 0x422   : > { %v5884_v2 = vpop.f32.mrb[0].mxu0 }
 0x423   : > { %v714_v4 = vpop.f32.mrb[1].mxu0 }
 0x424   : > { %5907 = vmatprep.mubr.msk.f32.mxu0 %vm341_vm1, %v714_v4 }
 0x425   : > { %5908 = vmatmul.mubr.msk.f32.vlgmr.msra.gmra.mrb[4].mxu0 %vm341_vm1, %v5884_v2 }
 0x426   : > { %6433 = vmatpush3.bf16.msra.mxu0 %v7141_v19  ;;  %v5887_v5 = vpop.f32.mrb[2].mxu0 }
 0x427   : > { %6435 = vmatprep.subr.bf16.mxu0 %v7150_v24  ;;  %v724_v7 = vpop.f32.mrb[3].mxu0 }
 0x428   : > { %5918 = vmatprep.mubr.msk.f32.mxu0 %vm341_vm1, %v724_v7 }
 0x42a   : > { %6437 = vmatpush3.bf16.msra.mxu0 %v7150_v24 }
 0x42d   : > { %5919 = vmatmul.mubr.msk.f32.vlgmr.msra.gmra.mrb[4].mxu0 %vm341_vm1, %v5887_v5 }
 0x42e   : > { %5968 = vmatprep.mubr.msk.f32.mxu0 %vm241_vm0, %v7068_v0 }
 0x500   : > { %v5920_v11 = vpop.f32.mrb[4].mxu0 }
 0x501   : > { %v6784_v14 = vadd.f32 %v5920_v11, %v5319_v8  ;;  %v972_v15 = vpop.f32.mrb[5].mxu0 }
 0x502   : > { %v6785_v17 = vadd.f32 %v5318_v10, %v972_v15 }
 0x503   : > { %v5327_v18 = vmul.f32 -1.442695, %v6784_v14 }
 0x504   : > { %v5326_v20 = vmul.f32 -1.442695, %v6785_v17 }
 0x505   : > { %6879 = vpow2.f32 %v5327_v18 }
 0x506   : > { %6881 = vpow2.f32 %v5326_v20 }
 0x50f   : > { %v6880_v21 = vpop.eup %6879 }
 0x510   : > { %v6882_v22 = vpop.eup %6881  ;;  %v990_v23 = vadd.f32 1.0, %v6880_v21 }
 0x511   : > { %v989_v25 = vadd.f32 1.0, %v6882_v22 }
 0x512   : > { %6883 = vrcp.f32 %v990_v23 }
 0x513   : > { %6885 = vrcp.f32 %v989_v25 }
 0x51c   : > { %v6884_v26 = vpop.eup %6883 }
 0x51d   : > { %v6886_v27 = vpop.eup %6885  ;;  %v996_v28 = vmul.f32 2.0, %v6884_v26  ;;  %v1000_v36 = vmul.f32 %v6884_v26, %v7184_v54 }
 0x51e   : > { %v995_v29 = vmul.f32 2.0, %v6886_v27  ;;  %v999_v38 = vmul.f32 %v6886_v27, %v7181_v51 }
 0x51f   : > { %v5329_v30 = vadd.f32 -1.0, %v996_v28 }
 0x520   : > { %v5328_v31 = vadd.f32 -1.0, %v995_v29 }
 0x521   : > { %1005 = vrot.lane.b32.xlu1 %v5329_v30, %s7024_s8 }
 0x522   : > { %1003 = vrot.lane.b32.xlu0 %v5328_v31, %s7024_s8 }
 0x593   : > { %v1006_v32 = vpop.permute.xlu1 %1005 }
 0x594   : > { %v1010_v33 = vmul.f32 %v6884_v26, %v1006_v32  ;;  %v1004_v34 = vpop.permute.xlu0 %1003 }
 0x595   : > { %v1009_v35 = vmul.f32 %v6886_v27, %v1004_v34 }
 0x596   : > { %1015 = vrot.lane.b32.xlu1 %v1010_v33, %s7025_s9 }
 0x597   : > { %1013 = vrot.lane.b32.xlu0 %v1009_v35, %s7025_s9 }
 0x59a   : > { %1027 = vrot.lane.b32.xlu1 %v6884_v26, %s7024_s8 }
 0x59b   : > { %1025 = vrot.lane.b32.xlu0 %v6886_v27, %s7024_s8 }
 0x608   : > { %v1016_v37 = vpop.permute.xlu1 %1015 }
 0x609   : > { %v7227_v39 = vadd.f32 %v1016_v37, %v1000_v36  ;;  %v1014_v40 = vpop.permute.xlu0 %1013 }
 0x60a   : > { %v7229_v41 = vadd.f32 %v1014_v40, %v999_v38 }
 0x60b   : > { %6887 = vtanh.f32 %v7227_v39 }
 0x60c   : > { %6889 = vtanh.f32 %v7229_v41  ;;  %v1028_v43 = vpop.permute.xlu1 %1027 }
 0x60d   : > { %v1026_v46 = vpop.permute.xlu0 %1025 }
 0x615   : > { %v6888_v42 = vpop.eup %6887 }
 0x616   : > { %v6890_v44 = vpop.eup %6889  ;;  %v7233_v45 = vmul.f32 %v6888_v42, %v1028_v43  ;;  %v5351_v42 = vld [vmem:[%s7171_s7 + $0x38] sm:$0xff]  ;;  %v5350_v43 = vld [vmem:[%s7171_s7 + $0x30] sm:$0xff] }
 0x617   : > { %v7235_v47 = vmul.f32 %v6890_v44, %v1026_v46 }
 0x618   : > { %1046 = vrot.lane.b32.xlu1 %v7233_v45, %s7025_s9 }
 0x619   : > { %1044 = vrot.lane.b32.xlu0 %v7235_v47, %s7025_s9 }
 0x68a   : > { %v1047_v48 = vpop.permute.xlu1 %1046 }
 0x68b   : > { %v1045_v49 = vpop.permute.xlu0 %1044 }
 0x68c   : > { %v6438_v50 = vpack.c.bf16 %v1047_v48, %v1045_v49 }
 0x68e   : > { %6439 = vmatprep.subr.bf16.mxu1 %v6438_v50 }
 0x68f   : > { %6441 = vmatpush3.bf16.msra.mxu1 %v6438_v50 }
 0x690   : > { %6443 = vmatprep.subr.bf16.mxu1 %v7088_v6 }
 0x692   : > { %5926 = vmatmul.mubr.msk.f32.vlgmr.msra.gmra.mrb[6].mxu1 %vm241_vm0, %v7073_v1 }
 0x693   : > { %6445 = vmatpush3.bf16.msra.mxu1 %v7088_v6  ;;  %5928 = vmatprep.mubr.msk.f32.mxu1 %vm241_vm0, %v7080_v3 }
 0x694   : > { %6447 = vmatprep.subr.bf16.mxu1 %v7100_v9 }
 0x696   : > { %5929 = vmatmul.mubr.msk.f32.gmra.mrb[8].mxu1 %vm241_vm0, %v7113_v12 }
 0x697   : > { %6449 = vmatpush3.bf16.msra.mxu1 %v7100_v9  ;;  %5939 = vmatprep.mubr.msk.f32.mxu1 %vm341_vm1, %v1045_v49 }
 0x698   : > { %6451 = vmatprep.subr.bf16.mxu1 %v7118_v13 }
 0x69a   : > { %5940 = vmatmul.mubr.msk.f32.vlgmr.msra.gmra.mrb[10].mxu1 %vm341_vm1, %v1047_v48 }
 0x69b   : > { %6453 = vmatpush3.bf16.msra.mxu1 %v7118_v13 }
 0x69c   : > { %6455 = vmatprep.subr.bf16.mxu1 %v7130_v16 }
 0x69f   : > { %6457 = vmatpush3.bf16.msra.mxu1 %v7130_v16 }
 0x6a0   : > { %6459 = vmatprep.subr.bf16.mxu1 %v7141_v19 }
 0x765   : > { %v5927_v51 = vpop.f32.mrb[6].mxu1 }
 0x766   : > { %v1116_v52 = vpop.f32.mrb[7].mxu1 }
 0x767   : > { %5950 = vmatprep.mubr.msk.f32.mxu1 %vm341_vm1, %v1116_v52 }
 0x768   : > { %5951 = vmatmul.mubr.msk.f32.vlgmr.msra.gmra.mrb[10].mxu1 %vm341_vm1, %v5927_v51 }
 0x769   : > { %6461 = vmatpush3.bf16.msra.mxu1 %v7141_v19  ;;  %v5930_v53 = vpop.f32.mrb[8].mxu1 }
 0x76a   : > { %6463 = vmatprep.subr.bf16.mxu1 %v7150_v24  ;;  %v1126_v54 = vpop.f32.mrb[9].mxu1 }
 0x76b   : > { %5961 = vmatprep.mubr.msk.f32.mxu1 %vm341_vm1, %v1126_v54 }
 0x76d   : > { %6465 = vmatpush3.bf16.msra.mxu1 %v7150_v24 }
 0x770   : > { %5962 = vmatmul.mubr.msk.f32.vlgmr.msra.gmra.mrb[10].mxu1 %vm341_vm1, %v5930_v53 }
 0x771   : > { %6011 = vmatprep.mubr.msk.f32.mxu1 %vm241_vm0, %v7068_v0 }
 0x843   : > { %v5963_v57 = vpop.f32.mrb[10].mxu1 }
 0x844   : > { %v6786_v58 = vadd.f32 %v5963_v57, %v5335_v55  ;;  %v1374_v59 = vpop.f32.mrb[11].mxu1 }
 0x845   : > { %v6787_v60 = vadd.f32 %v5334_v56, %v1374_v59 }
 0x846   : > { %v5343_v61 = vmul.f32 -1.442695, %v6786_v58 }
 0x847   : > { %v5342_v62 = vmul.f32 -1.442695, %v6787_v60 }
 0x848   : > { %6891 = vpow2.f32 %v5343_v61 }
 0x849   : > { %6893 = vpow2.f32 %v5342_v62 }
 0x852   : > { %v6892_v63 = vpop.eup %6891 }
 0x853   : > { %v6894_v2 = vpop.eup %6893  ;;  %v1392_v4 = vadd.f32 1.0, %v6892_v63 }
 0x854   : > { %v1391_v5 = vadd.f32 1.0, %v6894_v2 }
 0x855   : > { %6895 = vrcp.f32 %v1392_v4 }
 0x856   : > { %6897 = vrcp.f32 %v1391_v5 }
 0x85f   : > { %v6896_v7 = vpop.eup %6895 }
 0x860   : > { %v6898_v8 = vpop.eup %6897  ;;  %v1398_v10 = vmul.f32 2.0, %v6896_v7  ;;  %v1402_v22 = vmul.f32 %v6896_v7, %v7227_v39 }
 0x861   : > { %v1397_v11 = vmul.f32 2.0, %v6898_v8  ;;  %v1401_v25 = vmul.f32 %v6898_v8, %v7229_v41 }
 0x862   : > { %v5345_v14 = vadd.f32 -1.0, %v1398_v10 }
 0x863   : > { %v5344_v15 = vadd.f32 -1.0, %v1397_v11 }
 0x864   : > { %1407 = vrot.lane.b32.xlu1 %v5345_v14, %s7024_s8 }
 0x865   : > { %1405 = vrot.lane.b32.xlu0 %v5344_v15, %s7024_s8 }
 0x8d6   : > { %v1408_v17 = vpop.permute.xlu1 %1407 }
 0x8d7   : > { %v1412_v18 = vmul.f32 %v6896_v7, %v1408_v17  ;;  %v1406_v20 = vpop.permute.xlu0 %1405 }
 0x8d8   : > { %v1411_v21 = vmul.f32 %v6898_v8, %v1406_v20 }
 0x8d9   : > { %1417 = vrot.lane.b32.xlu1 %v1412_v18, %s7025_s9 }
 0x8da   : > { %1415 = vrot.lane.b32.xlu0 %v1411_v21, %s7025_s9 }
 0x8dd   : > { %1429 = vrot.lane.b32.xlu1 %v6896_v7, %s7024_s8 }
 0x8de   : > { %1427 = vrot.lane.b32.xlu0 %v6898_v8, %s7024_s8 }
 0x94b   : > { %v1418_v23 = vpop.permute.xlu1 %1417 }
 0x94c   : > { %v7277_v26 = vadd.f32 %v1418_v23, %v1402_v22  ;;  %v1416_v27 = vpop.permute.xlu0 %1415 }
 0x94d   : > { %v7279_v28 = vadd.f32 %v1416_v27, %v1401_v25 }
 0x94e   : > { %6899 = vtanh.f32 %v7277_v26 }
 0x94f   : > { %6901 = vtanh.f32 %v7279_v28  ;;  %v1430_v30 = vpop.permute.xlu1 %1429 }
 0x950   : > { %v1428_v33 = vpop.permute.xlu0 %1427 }
 0x958   : > { %v6900_v29 = vpop.eup %6899 }
 0x959   : > { %v6902_v31 = vpop.eup %6901  ;;  %v7283_v32 = vmul.f32 %v6900_v29, %v1430_v30 }
 0x95a   : > { %v7285_v34 = vmul.f32 %v6902_v31, %v1428_v33  ;;  %v5367_v31 = vld [vmem:[%s7171_s7 + $0x48] sm:$0xff]  ;;  %v5366_v33 = vld [vmem:[%s7171_s7 + $0x40] sm:$0xff] }
 0x95b   : > { %1442 = vrot.lane.b32.xlu1 %v7283_v32, %s7025_s9 }
 0x95c   : > { %1440 = vrot.lane.b32.xlu0 %v7285_v34, %s7025_s9 }
 0x9cd   : > { %v1443_v35 = vpop.permute.xlu1 %1442 }
 0x9ce   : > { %v1441_v36 = vpop.permute.xlu0 %1440 }
 0x9cf   : > { %v6466_v37 = vpack.c.bf16 %v1443_v35, %v1441_v36 }
 0x9d1   : > { %6467 = vmatprep.subr.bf16.mxu0 %v6466_v37 }
 0x9d2   : > { %6469 = vmatpush3.bf16.msra.mxu0 %v6466_v37 }
 0x9d3   : > { %6471 = vmatprep.subr.bf16.mxu0 %v7088_v6 }
 0x9d5   : > { %5969 = vmatmul.mubr.msk.f32.vlgmr.msra.gmra.mrb[6].mxu0 %vm241_vm0, %v7073_v1 }
 0x9d6   : > { %6473 = vmatpush3.bf16.msra.mxu0 %v7088_v6  ;;  %5971 = vmatprep.mubr.msk.f32.mxu0 %vm241_vm0, %v7080_v3 }
 0x9d7   : > { %6475 = vmatprep.subr.bf16.mxu0 %v7100_v9 }
 0x9d9   : > { %5972 = vmatmul.mubr.msk.f32.gmra.mrb[8].mxu0 %vm241_vm0, %v7113_v12 }
 0x9da   : > { %6477 = vmatpush3.bf16.msra.mxu0 %v7100_v9  ;;  %5982 = vmatprep.mubr.msk.f32.mxu0 %vm341_vm1, %v1441_v36 }
 0x9db   : > { %6479 = vmatprep.subr.bf16.mxu0 %v7118_v13 }
 0x9dd   : > { %5983 = vmatmul.mubr.msk.f32.vlgmr.msra.gmra.mrb[10].mxu0 %vm341_vm1, %v1443_v35 }
 0x9de   : > { %6481 = vmatpush3.bf16.msra.mxu0 %v7118_v13 }
 0x9df   : > { %6483 = vmatprep.subr.bf16.mxu0 %v7130_v16 }
 0x9e2   : > { %6485 = vmatpush3.bf16.msra.mxu0 %v7130_v16 }
 0x9e3   : > { %6487 = vmatprep.subr.bf16.mxu0 %v7141_v19 }
 0xaa8   : > { %v5970_v38 = vpop.f32.mrb[6].mxu0 }
 0xaa9   : > { %v1512_v39 = vpop.f32.mrb[7].mxu0 }
 0xaaa   : > { %5993 = vmatprep.mubr.msk.f32.mxu0 %vm341_vm1, %v1512_v39 }
 0xaab   : > { %5994 = vmatmul.mubr.msk.f32.vlgmr.msra.gmra.mrb[10].mxu0 %vm341_vm1, %v5970_v38 }
 0xaac   : > { %6489 = vmatpush3.bf16.msra.mxu0 %v7141_v19  ;;  %v5973_v40 = vpop.f32.mrb[8].mxu0 }
 0xaad   : > { %6491 = vmatprep.subr.bf16.mxu0 %v7150_v24  ;;  %v1522_v41 = vpop.f32.mrb[9].mxu0 }
 0xaae   : > { %6004 = vmatprep.mubr.msk.f32.mxu0 %vm341_vm1, %v1522_v41 }
 0xab0   : > { %6493 = vmatpush3.bf16.msra.mxu0 %v7150_v24 }
 0xab3   : > { %6005 = vmatmul.mubr.msk.f32.vlgmr.msra.gmra.mrb[10].mxu0 %vm341_vm1, %v5973_v40 }
 0xab4   : > { %6054 = vmatprep.mubr.msk.f32.mxu0 %vm241_vm0, %v7068_v0 }
 0xb86   : > { %v6006_v44 = vpop.f32.mrb[10].mxu0 }
 0xb87   : > { %v6788_v46 = vadd.f32 %v6006_v44, %v5351_v42  ;;  %v1770_v48 = vpop.f32.mrb[11].mxu0 }
 0xb88   : > { %v6789_v49 = vadd.f32 %v5350_v43, %v1770_v48 }
 0xb89   : > { %v5359_v50 = vmul.f32 -1.442695, %v6788_v46 }
 0xb8a   : > { %v5358_v51 = vmul.f32 -1.442695, %v6789_v49 }
 0xb8b   : > { %6903 = vpow2.f32 %v5359_v50 }
 0xb8c   : > { %6905 = vpow2.f32 %v5358_v51 }
 0xb95   : > { %v6904_v52 = vpop.eup %6903 }
 0xb96   : > { %v6906_v53 = vpop.eup %6905  ;;  %v1788_v54 = vadd.f32 1.0, %v6904_v52 }
 0xb97   : > { %v1787_v55 = vadd.f32 1.0, %v6906_v53 }
 0xb98   : > { %6907 = vrcp.f32 %v1788_v54 }
 0xb99   : > { %6909 = vrcp.f32 %v1787_v55 }
 0xba2   : > { %v6908_v56 = vpop.eup %6907 }
 0xba3   : > { %v6910_v57 = vpop.eup %6909  ;;  %v1794_v58 = vmul.f32 2.0, %v6908_v56  ;;  %v1798_v5 = vmul.f32 %v6908_v56, %v7277_v26 }
 0xba4   : > { %v1793_v59 = vmul.f32 2.0, %v6910_v57  ;;  %v1797_v8 = vmul.f32 %v6910_v57, %v7279_v28 }
 0xba5   : > { %v5361_v60 = vadd.f32 -1.0, %v1794_v58 }
 0xba6   : > { %v5360_v61 = vadd.f32 -1.0, %v1793_v59 }
 0xba7   : > { %1803 = vrot.lane.b32.xlu1 %v5361_v60, %s7024_s8 }
 0xba8   : > { %1801 = vrot.lane.b32.xlu0 %v5360_v61, %s7024_s8 }
 0xc19   : > { %v1804_v62 = vpop.permute.xlu1 %1803 }
 0xc1a   : > { %v1808_v63 = vmul.f32 %v6908_v56, %v1804_v62  ;;  %v1802_v2 = vpop.permute.xlu0 %1801 }
 0xc1b   : > { %v1807_v4 = vmul.f32 %v6910_v57, %v1802_v2 }
 0xc1c   : > { %1813 = vrot.lane.b32.xlu1 %v1808_v63, %s7025_s9 }
 0xc1d   : > { %1811 = vrot.lane.b32.xlu0 %v1807_v4, %s7025_s9 }
 0xc20   : > { %1825 = vrot.lane.b32.xlu1 %v6908_v56, %s7024_s8 }
 0xc21   : > { %1823 = vrot.lane.b32.xlu0 %v6910_v57, %s7024_s8 }
 0xc8e   : > { %v1814_v7 = vpop.permute.xlu1 %1813 }
 0xc8f   : > { %v7327_v10 = vadd.f32 %v1814_v7, %v1798_v5  ;;  %v1812_v11 = vpop.permute.xlu0 %1811 }
 0xc90   : > { %v7329_v14 = vadd.f32 %v1812_v11, %v1797_v8 }
 0xc91   : > { %6911 = vtanh.f32 %v7327_v10 }
 0xc92   : > { %6913 = vtanh.f32 %v7329_v14  ;;  %v1826_v17 = vpop.permute.xlu1 %1825 }
 0xc93   : > { %v1824_v21 = vpop.permute.xlu0 %1823 }
 0xc9b   : > { %v6912_v15 = vpop.eup %6911 }
 0xc9c   : > { %v6914_v18 = vpop.eup %6913  ;;  %v7333_v20 = vmul.f32 %v6912_v15, %v1826_v17 }
 0xc9d   : > { %v7335_v22 = vmul.f32 %v6914_v18, %v1824_v21 }
 0xc9e   : > { %1844 = vrot.lane.b32.xlu1 %v7333_v20, %s7025_s9 }
 0xc9f   : > { %1842 = vrot.lane.b32.xlu0 %v7335_v22, %s7025_s9 }
 0xd10   : > { %v1845_v23 = vpop.permute.xlu1 %1844 }
 0xd11   : > { %v1843_v25 = vpop.permute.xlu0 %1842 }
 0xd12   : > { %v6494_v26 = vpack.c.bf16 %v1845_v23, %v1843_v25 }
 0xd14   : > { %6495 = vmatprep.subr.bf16.mxu1 %v6494_v26 }
 0xd15   : > { %6497 = vmatpush3.bf16.msra.mxu1 %v6494_v26 }
 0xd16   : > { %6499 = vmatprep.subr.bf16.mxu1 %v7088_v6 }
 0xd18   : > { %6012 = vmatmul.mubr.msk.f32.vlgmr.msra.gmra.mrb[12].mxu1 %vm241_vm0, %v7073_v1 }
 0xd19   : > { %6501 = vmatpush3.bf16.msra.mxu1 %v7088_v6  ;;  %6014 = vmatprep.mubr.msk.f32.mxu1 %vm241_vm0, %v7080_v3 }
 0xd1a   : > { %6503 = vmatprep.subr.bf16.mxu1 %v7100_v9 }
 0xd1c   : > { %6015 = vmatmul.mubr.msk.f32.gmra.mrb[14].mxu1 %vm241_vm0, %v7113_v12 }
 0xd1d   : > { %6505 = vmatpush3.bf16.msra.mxu1 %v7100_v9  ;;  %6025 = vmatprep.mubr.msk.f32.mxu1 %vm341_vm1, %v1843_v25  ;;  %v5382_v25 = vld [vmem:[%s7171_s7 + $0x50] sm:$0xff] }
 0xd1e   : > { %6507 = vmatprep.subr.bf16.mxu1 %v7118_v13 }
 0xd20   : > { %6026 = vmatmul.mubr.msk.f32.vlgmr.msra.gmra.mrb[16].mxu1 %vm341_vm1, %v1845_v23  ;;  %v5383_v23 = vld [vmem:[%s7171_s7 + $0x58] sm:$0xff] }
 0xd21   : > { %6509 = vmatpush3.bf16.msra.mxu1 %v7118_v13 }
 0xd22   : > { %6511 = vmatprep.subr.bf16.mxu1 %v7130_v16 }
 0xd25   : > { %6513 = vmatpush3.bf16.msra.mxu1 %v7130_v16 }
 0xd26   : > { %6515 = vmatprep.subr.bf16.mxu1 %v7141_v19 }
 0xdeb   : > { %v6013_v27 = vpop.f32.mrb[12].mxu1 }
 0xdec   : > { %v1914_v28 = vpop.f32.mrb[13].mxu1 }
 0xded   : > { %6036 = vmatprep.mubr.msk.f32.mxu1 %vm341_vm1, %v1914_v28 }
 0xdee   : > { %6037 = vmatmul.mubr.msk.f32.vlgmr.msra.gmra.mrb[16].mxu1 %vm341_vm1, %v6013_v27 }
 0xdef   : > { %6517 = vmatpush3.bf16.msra.mxu1 %v7141_v19  ;;  %v6016_v29 = vpop.f32.mrb[14].mxu1 }
 0xdf0   : > { %6519 = vmatprep.subr.bf16.mxu1 %v7150_v24  ;;  %v1924_v30 = vpop.f32.mrb[15].mxu1 }
 0xdf1   : > { %6047 = vmatprep.mubr.msk.f32.mxu1 %vm341_vm1, %v1924_v30 }
 0xdf3   : > { %6521 = vmatpush3.bf16.msra.mxu1 %v7150_v24 }
 0xdf6   : > { %6048 = vmatmul.mubr.msk.f32.vlgmr.msra.gmra.mrb[16].mxu1 %vm341_vm1, %v6016_v29 }
 0xdf7   : > { %6097 = vmatprep.mubr.msk.f32.mxu1 %vm241_vm0, %v7068_v0 }
 0xec9   : > { %v6049_v35 = vpop.f32.mrb[16].mxu1 }
 0xeca   : > { %v6790_v36 = vadd.f32 %v6049_v35, %v5367_v31  ;;  %v2172_v37 = vpop.f32.mrb[17].mxu1 }
 0xecb   : > { %v6791_v38 = vadd.f32 %v5366_v33, %v2172_v37 }
 0xecc   : > { %v5375_v39 = vmul.f32 -1.442695, %v6790_v36 }
 0xecd   : > { %v5374_v40 = vmul.f32 -1.442695, %v6791_v38 }
 0xece   : > { %6915 = vpow2.f32 %v5375_v39 }
 0xecf   : > { %6917 = vpow2.f32 %v5374_v40 }
 0xed8   : > { %v6916_v41 = vpop.eup %6915 }
 0xed9   : > { %v6918_v42 = vpop.eup %6917  ;;  %v2190_v43 = vadd.f32 1.0, %v6916_v41 }
 0xeda   : > { %v2189_v44 = vadd.f32 1.0, %v6918_v42 }
 0xedb   : > { %6919 = vrcp.f32 %v2190_v43 }
 0xedc   : > { %6921 = vrcp.f32 %v2189_v44 }
 0xee5   : > { %v6920_v46 = vpop.eup %6919 }
 0xee6   : > { %v6922_v48 = vpop.eup %6921  ;;  %v2196_v49 = vmul.f32 2.0, %v6920_v46  ;;  %v2200_v57 = vmul.f32 %v6920_v46, %v7327_v10 }
 0xee7   : > { %v2195_v50 = vmul.f32 2.0, %v6922_v48  ;;  %v2199_v59 = vmul.f32 %v6922_v48, %v7329_v14 }
 0xee8   : > { %v5377_v51 = vadd.f32 -1.0, %v2196_v49 }
 0xee9   : > { %v5376_v52 = vadd.f32 -1.0, %v2195_v50 }
 0xeea   : > { %2205 = vrot.lane.b32.xlu1 %v5377_v51, %s7024_s8 }
 0xeeb   : > { %2203 = vrot.lane.b32.xlu0 %v5376_v52, %s7024_s8 }
 0xf5c   : > { %v2206_v53 = vpop.permute.xlu1 %2205 }
 0xf5d   : > { %v2210_v54 = vmul.f32 %v6920_v46, %v2206_v53  ;;  %v2204_v55 = vpop.permute.xlu0 %2203 }
 0xf5e   : > { %v2209_v56 = vmul.f32 %v6922_v48, %v2204_v55 }
 0xf5f   : > { %2215 = vrot.lane.b32.xlu1 %v2210_v54, %s7025_s9 }
 0xf60   : > { %2213 = vrot.lane.b32.xlu0 %v2209_v56, %s7025_s9 }
 0xf63   : > { %2227 = vrot.lane.b32.xlu1 %v6920_v46, %s7024_s8 }
 0xf64   : > { %2225 = vrot.lane.b32.xlu0 %v6922_v48, %s7024_s8 }
 0xfd1   : > { %v2216_v58 = vpop.permute.xlu1 %2215 }
 0xfd2   : > { %v7377_v60 = vadd.f32 %v2216_v58, %v2200_v57  ;;  %v2214_v61 = vpop.permute.xlu0 %2213 }
 0xfd3   : > { %v7379_v62 = vadd.f32 %v2214_v61, %v2199_v59 }
 0xfd4   : > { %6923 = vtanh.f32 %v7377_v60 }
 0xfd5   : > { %6925 = vtanh.f32 %v7379_v62  ;;  %v2228_v2 = vpop.permute.xlu1 %2227 }
 0xfd6   : > { %v2226_v7 = vpop.permute.xlu0 %2225 }
 0xfde   : > { %v6924_v63 = vpop.eup %6923 }
 0xfdf   : > { %v6926_v4 = vpop.eup %6925  ;;  %v2232_v5 = vmul.f32 %v6924_v63, %v2228_v2 }
 0xfe0   : > { %v2231_v8 = vmul.f32 %v6926_v4, %v2226_v7  ;;  %v7464_v4 = vld [vmem:[%s7948_s1] sm:$0xff] }
 0xfe1   : > { %2237 = vrot.lane.b32.xlu1 %v2232_v5, %s7025_s9  ;;  %v5399_v5 = vld [vmem:[%s7171_s7 + $0x68] sm:$0xff]  ;;  %v5398_v7 = vld [vmem:[%s7171_s7 + $0x60] sm:$0xff] }
 0xfe2   : > { %2235 = vrot.lane.b32.xlu0 %v2231_v8, %s7025_s9 }
0x1053   : > { %v2238_v10 = vpop.permute.xlu1 %2237 }
0x1054   : > { %2242 = vst.msk [vmem:[#allocation2 + $0x20] sm:$0xff] %vm341_vm1, %v2238_v10  ;;  %v2236_v11 = vpop.permute.xlu0 %2235 }
0x1055   : > { %2241 = vst.msk [vmem:[#allocation2 + $0x8] sm:$0xff] %vm341_vm1, %v2236_v11  ;;  %v6522_v14 = vpack.c.bf16 %v2238_v10, %v2236_v11 }
0x1057   : > { %6523 = vmatprep.subr.bf16.mxu0 %v6522_v14 }
0x1058   : > { %6525 = vmatpush3.bf16.msra.mxu0 %v6522_v14 }
0x1059   : > { %6527 = vmatprep.subr.bf16.mxu0 %v7088_v6 }
0x105b   : > { %6055 = vmatmul.mubr.msk.f32.vlgmr.msra.gmra.mrb[12].mxu0 %vm241_vm0, %v7073_v1 }
0x105c   : > { %6529 = vmatpush3.bf16.msra.mxu0 %v7088_v6  ;;  %6057 = vmatprep.mubr.msk.f32.mxu0 %vm241_vm0, %v7080_v3 }
0x105d   : > { %6531 = vmatprep.subr.bf16.mxu0 %v7100_v9 }
0x105f   : > { %6058 = vmatmul.mubr.msk.f32.gmra.mrb[14].mxu0 %vm241_vm0, %v7113_v12 }
0x1060   : > { %6533 = vmatpush3.bf16.msra.mxu0 %v7100_v9  ;;  %6068 = vmatprep.mubr.msk.f32.mxu0 %vm341_vm1, %v2236_v11 }
0x1061   : > { %6535 = vmatprep.subr.bf16.mxu0 %v7118_v13 }
0x1063   : > { %6069 = vmatmul.mubr.msk.f32.vlgmr.msra.gmra.mrb[16].mxu0 %vm341_vm1, %v2238_v10 }
0x1064   : > { %6537 = vmatpush3.bf16.msra.mxu0 %v7118_v13 }
0x1065   : > { %6539 = vmatprep.subr.bf16.mxu0 %v7130_v16 }
0x1068   : > { %6541 = vmatpush3.bf16.msra.mxu0 %v7130_v16 }
0x1069   : > { %6543 = vmatprep.subr.bf16.mxu0 %v7141_v19 }
0x112e   : > { %v6056_v15 = vpop.f32.mrb[12].mxu0 }
0x112f   : > { %v2309_v17 = vpop.f32.mrb[13].mxu0 }
0x1130   : > { %6079 = vmatprep.mubr.msk.f32.mxu0 %vm341_vm1, %v2309_v17 }
0x1131   : > { %6080 = vmatmul.mubr.msk.f32.vlgmr.msra.gmra.mrb[16].mxu0 %vm341_vm1, %v6056_v15 }
0x1132   : > { %6545 = vmatpush3.bf16.msra.mxu0 %v7141_v19  ;;  %v6059_v18 = vpop.f32.mrb[14].mxu0 }
0x1133   : > { %6547 = vmatprep.subr.bf16.mxu0 %v7150_v24  ;;  %v2319_v21 = vpop.f32.mrb[15].mxu0 }
0x1134   : > { %6090 = vmatprep.mubr.msk.f32.mxu0 %vm341_vm1, %v2319_v21 }
0x1136   : > { %6549 = vmatpush3.bf16.msra.mxu0 %v7150_v24 }
0x1139   : > { %6091 = vmatmul.mubr.msk.f32.vlgmr.msra.gmra.mrb[16].mxu0 %vm341_vm1, %v6059_v18 }
0x113a   : > { %6140 = vmatprep.mubr.msk.f32.mxu0 %vm241_vm0, %v7068_v0 }
0x120c   : > { %v6092_v26 = vpop.f32.mrb[16].mxu0 }
0x120d   : > { %v6792_v27 = vadd.f32 %v6092_v26, %v5383_v23  ;;  %v2567_v28 = vpop.f32.mrb[17].mxu0 }
0x120e   : > { %v6793_v29 = vadd.f32 %v5382_v25, %v2567_v28 }
0x120f   : > { %v5391_v30 = vmul.f32 -1.442695, %v6792_v27 }
0x1210   : > { %v5390_v31 = vmul.f32 -1.442695, %v6793_v29 }
0x1211   : > { %6927 = vpow2.f32 %v5391_v30 }
0x1212   : > { %6929 = vpow2.f32 %v5390_v31 }
0x121b   : > { %v6928_v33 = vpop.eup %6927 }
0x121c   : > { %v6930_v35 = vpop.eup %6929  ;;  %v2585_v36 = vadd.f32 1.0, %v6928_v33 }
0x121d   : > { %v2584_v37 = vadd.f32 1.0, %v6930_v35 }
0x121e   : > { %6931 = vrcp.f32 %v2585_v36 }
0x121f   : > { %6933 = vrcp.f32 %v2584_v37 }
0x1228   : > { %v6932_v38 = vpop.eup %6931 }
0x1229   : > { %v6934_v39 = vpop.eup %6933  ;;  %v2591_v40 = vmul.f32 2.0, %v6932_v38  ;;  %v2595_v49 = vmul.f32 %v6932_v38, %v7377_v60 }
0x122a   : > { %v2590_v0 = vmul.f32 2.0, %v6934_v39  ;;  %v2594_v51 = vmul.f32 %v6934_v39, %v7379_v62 }
0x122b   : > { %v5393_v41 = vadd.f32 -1.0, %v2591_v40 }
0x122c   : > { %v5392_v42 = vadd.f32 -1.0, %v2590_v0 }
0x122d   : > { %2600 = vrot.lane.b32.xlu1 %v5393_v41, %s7024_s8 }
0x122e   : > { %2598 = vrot.lane.b32.xlu0 %v5392_v42, %s7024_s8 }
0x129f   : > { %v2601_v43 = vpop.permute.xlu1 %2600 }
0x12a0   : > { %v2605_v44 = vmul.f32 %v6932_v38, %v2601_v43  ;;  %v2599_v46 = vpop.permute.xlu0 %2598 }
0x12a1   : > { %v2604_v48 = vmul.f32 %v6934_v39, %v2599_v46 }
0x12a2   : > { %2610 = vrot.lane.b32.xlu1 %v2605_v44, %s7025_s9 }
0x12a3   : > { %2608 = vrot.lane.b32.xlu0 %v2604_v48, %s7025_s9 }
0x12a6   : > { %2622 = vrot.lane.b32.xlu1 %v6932_v38, %s7024_s8 }
0x12a7   : > { %2620 = vrot.lane.b32.xlu0 %v6934_v39, %s7024_s8 }
0x1314   : > { %v2611_v50 = vpop.permute.xlu1 %2610 }
0x1315   : > { %v7423_v52 = vadd.f32 %v2611_v50, %v2595_v49  ;;  %v2609_v53 = vpop.permute.xlu0 %2608 }
0x1316   : > { %v7425_v54 = vadd.f32 %v2609_v53, %v2594_v51 }
0x1317   : > { %6935 = vtanh.f32 %v7423_v52 }
0x1318   : > { %6937 = vtanh.f32 %v7425_v54  ;;  %v2623_v56 = vpop.permute.xlu1 %2622 }
0x1319   : > { %v2621_v59 = vpop.permute.xlu0 %2620 }
0x1321   : > { %v6936_v55 = vpop.eup %6935 }
0x1322   : > { %v6938_v57 = vpop.eup %6937  ;;  %v7429_v58 = vmul.f32 %v6936_v55, %v2623_v56  ;;  %v7504_v55 = vld [vmem:[%s7948_s1 + $0x10] sm:$0xff]  ;;  %v7512_v56 = vld [vmem:[%s7948_s1 + $0x18] sm:$0xff] }
0x1323   : > { %v7431_v61 = vmul.f32 %v6938_v57, %v2621_v59 }
0x1324   : > { %2640 = vrot.lane.b32.xlu1 %v7429_v58, %s7025_s9 }
0x1325   : > { %2638 = vrot.lane.b32.xlu0 %v7431_v61, %s7025_s9 }
0x1396   : > { %v2641_v60 = vpop.permute.xlu1 %2640 }
0x1397   : > { %v2639_v62 = vpop.permute.xlu0 %2638 }
0x1398   : > { %v6550_v63 = vpack.c.bf16 %v2641_v60, %v2639_v62 }
0x139a   : > { %6551 = vmatprep.subr.bf16.mxu1 %v6550_v63 }
0x139b   : > { %6553 = vmatpush3.bf16.msra.mxu1 %v6550_v63  ;;  %v5415_v63 = vld [vmem:[%s7171_s7 + $0x78] sm:$0xff] }
0x139c   : > { %6555 = vmatprep.subr.bf16.mxu1 %v7088_v6 }
0x139e   : > { %6098 = vmatmul.mubr.msk.f32.vlgmr.msra.gmra.mrb[18].mxu1 %vm241_vm0, %v7073_v1 }
0x139f   : > { %6557 = vmatpush3.bf16.msra.mxu1 %v7088_v6  ;;  %6100 = vmatprep.mubr.msk.f32.mxu1 %vm241_vm0, %v7080_v3 }
0x13a0   : > { %6559 = vmatprep.subr.bf16.mxu1 %v7100_v9 }
0x13a2   : > { %6101 = vmatmul.mubr.msk.f32.gmra.mrb[20].mxu1 %vm241_vm0, %v7113_v12 }
0x13a3   : > { %6561 = vmatpush3.bf16.msra.mxu1 %v7100_v9  ;;  %6111 = vmatprep.mubr.msk.f32.mxu1 %vm341_vm1, %v2639_v62 }
0x13a4   : > { %6563 = vmatprep.subr.bf16.mxu1 %v7118_v13 }
0x13a6   : > { %6112 = vmatmul.mubr.msk.f32.vlgmr.msra.gmra.mrb[22].mxu1 %vm341_vm1, %v2641_v60 }
0x13a7   : > { %6565 = vmatpush3.bf16.msra.mxu1 %v7118_v13 }
0x13a8   : > { %6567 = vmatprep.subr.bf16.mxu1 %v7130_v16 }
0x13ab   : > { %6569 = vmatpush3.bf16.msra.mxu1 %v7130_v16 }
0x13ac   : > { %6571 = vmatprep.subr.bf16.mxu1 %v7141_v19 }
0x1471   : > { %v6099_v1 = vpop.f32.mrb[18].mxu1 }
0x1472   : > { %v2710_v3 = vpop.f32.mrb[19].mxu1 }
0x1473   : > { %6122 = vmatprep.mubr.msk.f32.mxu1 %vm341_vm1, %v2710_v3 }
0x1474   : > { %6123 = vmatmul.mubr.msk.f32.vlgmr.msra.gmra.mrb[22].mxu1 %vm341_vm1, %v6099_v1  ;;  %v5414_v1 = vld [vmem:[%s7171_s7 + $0x70] sm:$0xff] }
0x1475   : > { %6573 = vmatpush3.bf16.msra.mxu1 %v7141_v19  ;;  %v6102_v12 = vpop.f32.mrb[20].mxu1 }
0x1476   : > { %6575 = vmatprep.subr.bf16.mxu1 %v7150_v24  ;;  %v2720_v2 = vpop.f32.mrb[21].mxu1 }
0x1477   : > { %6133 = vmatprep.mubr.msk.f32.mxu1 %vm341_vm1, %v2720_v2 }
0x1479   : > { %6577 = vmatpush3.bf16.msra.mxu1 %v7150_v24 }
0x147c   : > { %6134 = vmatmul.mubr.msk.f32.vlgmr.msra.gmra.mrb[22].mxu1 %vm341_vm1, %v6102_v12 }
0x147d   : > { %6183 = vmatprep.mubr.msk.f32.mxu1 %vm241_vm0, %v7464_v4 }
0x154f   : > { %v6135_v8 = vpop.f32.mrb[22].mxu1 }
0x1550   : > { %v6794_v10 = vadd.f32 %v6135_v8, %v5399_v5  ;;  %v2968_v11 = vpop.f32.mrb[23].mxu1 }
0x1551   : > { %v6795_v14 = vadd.f32 %v5398_v7, %v2968_v11 }
0x1552   : > { %v5407_v15 = vmul.f32 -1.442695, %v6794_v10 }
0x1553   : > { %v5406_v17 = vmul.f32 -1.442695, %v6795_v14 }
0x1554   : > { %6939 = vpow2.f32 %v5407_v15 }
0x1555   : > { %6941 = vpow2.f32 %v5406_v17 }
0x155e   : > { %v6940_v18 = vpop.eup %6939 }
0x155f   : > { %v6942_v21 = vpop.eup %6941  ;;  %v2986_v23 = vadd.f32 1.0, %v6940_v18 }
0x1560   : > { %v2985_v25 = vadd.f32 1.0, %v6942_v21 }
0x1561   : > { %6943 = vrcp.f32 %v2986_v23 }
0x1562   : > { %6945 = vrcp.f32 %v2985_v25 }
0x156b   : > { %v6944_v26 = vpop.eup %6943 }
0x156c   : > { %v6946_v27 = vpop.eup %6945  ;;  %v2992_v28 = vmul.f32 2.0, %v6944_v26  ;;  %v2996_v38 = vmul.f32 %v6944_v26, %v7423_v52 }
0x156d   : > { %v2991_v29 = vmul.f32 2.0, %v6946_v27  ;;  %v2995_v40 = vmul.f32 %v6946_v27, %v7425_v54  ;;  %v7496_v54 = vld [vmem:[%s7948_s1 + $0x8] sm:$0xff] }
0x156e   : > { %v5409_v30 = vadd.f32 -1.0, %v2992_v28 }
0x156f   : > { %v5408_v31 = vadd.f32 -1.0, %v2991_v29 }
0x1570   : > { %3001 = vrot.lane.b32.xlu1 %v5409_v30, %s7024_s8 }
0x1571   : > { %2999 = vrot.lane.b32.xlu0 %v5408_v31, %s7024_s8 }
0x15e2   : > { %v3002_v33 = vpop.permute.xlu1 %3001 }
0x15e3   : > { %v3006_v35 = vmul.f32 %v6944_v26, %v3002_v33  ;;  %v3000_v36 = vpop.permute.xlu0 %2999 }
0x15e4   : > { %v3005_v37 = vmul.f32 %v6946_v27, %v3000_v36 }
0x15e5   : > { %3011 = vrot.lane.b32.xlu1 %v3006_v35, %s7025_s9 }
0x15e6   : > { %3009 = vrot.lane.b32.xlu0 %v3005_v37, %s7025_s9 }
0x15e9   : > { %3023 = vrot.lane.b32.xlu1 %v6944_v26, %s7024_s8 }
0x15ea   : > { %3021 = vrot.lane.b32.xlu0 %v6946_v27, %s7024_s8 }
0x1657   : > { %v3012_v39 = vpop.permute.xlu1 %3011 }
0x1658   : > { %v7478_v0 = vadd.f32 %v3012_v39, %v2996_v38  ;;  %v3010_v41 = vpop.permute.xlu0 %3009 }
0x1659   : > { %v7480_v42 = vadd.f32 %v3010_v41, %v2995_v40 }
0x165a   : > { %6947 = vtanh.f32 %v7478_v0 }
0x165b   : > { %6949 = vtanh.f32 %v7480_v42  ;;  %v3024_v44 = vpop.permute.xlu1 %3023 }
0x165c   : > { %v3022_v49 = vpop.permute.xlu0 %3021 }
0x1664   : > { %v6948_v43 = vpop.eup %6947 }
0x1665   : > { %v6950_v46 = vpop.eup %6949  ;;  %v7484_v48 = vmul.f32 %v6948_v43, %v3024_v44 }
0x1666   : > { %v7486_v50 = vmul.f32 %v6950_v46, %v3022_v49 }
0x1667   : > { %3035 = vrot.lane.b32.xlu1 %v7484_v48, %s7025_s9 }
0x1668   : > { %3033 = vrot.lane.b32.xlu0 %v7486_v50, %s7025_s9 }
0x16d9   : > { %v3036_v51 = vpop.permute.xlu1 %3035 }
0x16da   : > { %v3034_v52 = vpop.permute.xlu0 %3033 }
0x16db   : > { %v6578_v53 = vpack.c.bf16 %v3036_v51, %v3034_v52 }
0x16dd   : > { %6579 = vmatprep.subr.bf16.mxu0 %v6578_v53 }
0x16de   : > { %6581 = vmatpush3.bf16.msra.mxu0 %v6578_v53 }
0x16df   : > { %6583 = vmatprep.subr.bf16.mxu0 %v7088_v6 }
0x16e1   : > { %6141 = vmatmul.mubr.msk.f32.vlgmr.msra.gmra.mrb[18].mxu0 %vm241_vm0, %v7496_v54 }
0x16e2   : > { %6585 = vmatpush3.bf16.msra.mxu0 %v7088_v6  ;;  %6143 = vmatprep.mubr.msk.f32.mxu0 %vm241_vm0, %v7504_v55 }
0x16e3   : > { %6587 = vmatprep.subr.bf16.mxu0 %v7100_v9 }
0x16e5   : > { %6144 = vmatmul.mubr.msk.f32.gmra.mrb[20].mxu0 %vm241_vm0, %v7512_v56 }
0x16e6   : > { %6589 = vmatpush3.bf16.msra.mxu0 %v7100_v9  ;;  %6154 = vmatprep.mubr.msk.f32.mxu0 %vm341_vm1, %v3034_v52 }
0x16e7   : > { %6591 = vmatprep.subr.bf16.mxu0 %v7118_v13 }
0x16e9   : > { %6155 = vmatmul.mubr.msk.f32.vlgmr.msra.gmra.mrb[22].mxu0 %vm341_vm1, %v3036_v51 }
0x16ea   : > { %6593 = vmatpush3.bf16.msra.mxu0 %v7118_v13 }
0x16eb   : > { %6595 = vmatprep.subr.bf16.mxu0 %v7130_v16 }
0x16ee   : > { %6597 = vmatpush3.bf16.msra.mxu0 %v7130_v16 }
0x16ef   : > { %6599 = vmatprep.subr.bf16.mxu0 %v7141_v19 }
0x17b4   : > { %v6142_v57 = vpop.f32.mrb[18].mxu0 }
0x17b5   : > { %v3105_v59 = vpop.f32.mrb[19].mxu0 }
0x17b6   : > { %6165 = vmatprep.mubr.msk.f32.mxu0 %vm341_vm1, %v3105_v59  ;;  %v5431_v59 = vld [vmem:[%s7171_s7 + $0x88] sm:$0xff] }
0x17b7   : > { %6166 = vmatmul.mubr.msk.f32.vlgmr.msra.gmra.mrb[22].mxu0 %vm341_vm1, %v6142_v57 }
0x17b8   : > { %6601 = vmatpush3.bf16.msra.mxu0 %v7141_v19  ;;  %v6145_v60 = vpop.f32.mrb[20].mxu0 }
0x17b9   : > { %6603 = vmatprep.subr.bf16.mxu0 %v7150_v24  ;;  %v3115_v62 = vpop.f32.mrb[21].mxu0 }
0x17ba   : > { %6176 = vmatprep.mubr.msk.f32.mxu0 %vm341_vm1, %v3115_v62 }
0x17bc   : > { %6605 = vmatpush3.bf16.msra.mxu0 %v7150_v24 }
0x17bf   : > { %6177 = vmatmul.mubr.msk.f32.vlgmr.msra.gmra.mrb[22].mxu0 %vm341_vm1, %v6145_v60  ;;  %v5430_v60 = vld [vmem:[%s7171_s7 + $0x80] sm:$0xff] }
0x17c0   : > { %6226 = vmatprep.mubr.msk.f32.mxu0 %vm241_vm0, %v7464_v4 }
0x1892   : > { %v6178_v3 = vpop.f32.mrb[22].mxu0 }
0x1893   : > { %v6796_v12 = vadd.f32 %v6178_v3, %v5415_v63  ;;  %v3363_v2 = vpop.f32.mrb[23].mxu0 }
0x1894   : > { %v6797_v5 = vadd.f32 %v5414_v1, %v3363_v2 }
0x1895   : > { %v5423_v7 = vmul.f32 -1.442695, %v6796_v12 }
0x1896   : > { %v5422_v8 = vmul.f32 -1.442695, %v6797_v5 }
0x1897   : > { %6951 = vpow2.f32 %v5423_v7 }
0x1898   : > { %6953 = vpow2.f32 %v5422_v8 }
0x18a1   : > { %v6952_v10 = vpop.eup %6951 }
0x18a2   : > { %v6954_v11 = vpop.eup %6953  ;;  %v3381_v14 = vadd.f32 1.0, %v6952_v10 }
0x18a3   : > { %v3380_v15 = vadd.f32 1.0, %v6954_v11 }
0x18a4   : > { %6955 = vrcp.f32 %v3381_v14 }
0x18a5   : > { %6957 = vrcp.f32 %v3380_v15 }
0x18ae   : > { %v6956_v17 = vpop.eup %6955 }
0x18af   : > { %v6958_v18 = vpop.eup %6957  ;;  %v3387_v21 = vmul.f32 2.0, %v6956_v17  ;;  %v3391_v31 = vmul.f32 %v6956_v17, %v7478_v0 }
0x18b0   : > { %v3386_v23 = vmul.f32 2.0, %v6958_v18  ;;  %v3390_v35 = vmul.f32 %v6958_v18, %v7480_v42 }
0x18b1   : > { %v5425_v25 = vadd.f32 -1.0, %v3387_v21 }
0x18b2   : > { %v5424_v26 = vadd.f32 -1.0, %v3386_v23 }
0x18b3   : > { %3396 = vrot.lane.b32.xlu1 %v5425_v25, %s7024_s8 }
0x18b4   : > { %3394 = vrot.lane.b32.xlu0 %v5424_v26, %s7024_s8 }
0x1925   : > { %v3397_v27 = vpop.permute.xlu1 %3396 }
0x1926   : > { %v3401_v28 = vmul.f32 %v6956_v17, %v3397_v27  ;;  %v3395_v29 = vpop.permute.xlu0 %3394 }
0x1927   : > { %v3400_v30 = vmul.f32 %v6958_v18, %v3395_v29 }
0x1928   : > { %3406 = vrot.lane.b32.xlu1 %v3401_v28, %s7025_s9 }
0x1929   : > { %3404 = vrot.lane.b32.xlu0 %v3400_v30, %s7025_s9 }
0x192c   : > { %3418 = vrot.lane.b32.xlu1 %v6956_v17, %s7024_s8 }
0x192d   : > { %3416 = vrot.lane.b32.xlu0 %v6958_v18, %s7024_s8 }
0x199a   : > { %v3407_v33 = vpop.permute.xlu1 %3406 }
0x199b   : > { %v7543_v36 = vadd.f32 %v3407_v33, %v3391_v31  ;;  %v3405_v37 = vpop.permute.xlu0 %3404 }
0x199c   : > { %v7545_v38 = vadd.f32 %v3405_v37, %v3390_v35 }
0x199d   : > { %6959 = vtanh.f32 %v7543_v36 }
0x199e   : > { %6961 = vtanh.f32 %v7545_v38  ;;  %v3419_v40 = vpop.permute.xlu1 %3418 }
0x199f   : > { %v3417_v44 = vpop.permute.xlu0 %3416 }
0x19a7   : > { %v6960_v39 = vpop.eup %6959 }
0x19a8   : > { %v6962_v41 = vpop.eup %6961  ;;  %v7549_v43 = vmul.f32 %v6960_v39, %v3419_v40 }
0x19a9   : > { %v7551_v46 = vmul.f32 %v6962_v41, %v3417_v44 }
0x19aa   : > { %3436 = vrot.lane.b32.xlu1 %v7549_v43, %s7025_s9 }
0x19ab   : > { %3434 = vrot.lane.b32.xlu0 %v7551_v46, %s7025_s9 }
0x1a1c   : > { %v3437_v0 = vpop.permute.xlu1 %3436 }
0x1a1d   : > { %v3435_v42 = vpop.permute.xlu0 %3434 }
0x1a1e   : > { %v6606_v49 = vpack.c.bf16 %v3437_v0, %v3435_v42 }
0x1a20   : > { %6607 = vmatprep.subr.bf16.mxu1 %v6606_v49 }
0x1a21   : > { %6609 = vmatpush3.bf16.msra.mxu1 %v6606_v49 }
0x1a22   : > { %6611 = vmatprep.subr.bf16.mxu1 %v7088_v6 }
0x1a24   : > { %6184 = vmatmul.mubr.msk.f32.vlgmr.msra.gmra.mrb[24].mxu1 %vm241_vm0, %v7496_v54 }
0x1a25   : > { %6613 = vmatpush3.bf16.msra.mxu1 %v7088_v6  ;;  %6186 = vmatprep.mubr.msk.f32.mxu1 %vm241_vm0, %v7504_v55 }
0x1a26   : > { %6615 = vmatprep.subr.bf16.mxu1 %v7100_v9 }
0x1a28   : > { %6187 = vmatmul.mubr.msk.f32.gmra.mrb[26].mxu1 %vm241_vm0, %v7512_v56 }
0x1a29   : > { %6617 = vmatpush3.bf16.msra.mxu1 %v7100_v9  ;;  %6197 = vmatprep.mubr.msk.f32.mxu1 %vm341_vm1, %v3435_v42 }
0x1a2a   : > { %6619 = vmatprep.subr.bf16.mxu1 %v7118_v13 }
0x1a2c   : > { %6198 = vmatmul.mubr.msk.f32.vlgmr.msra.gmra.mrb[28].mxu1 %vm341_vm1, %v3437_v0 }
0x1a2d   : > { %6621 = vmatpush3.bf16.msra.mxu1 %v7118_v13 }
0x1a2e   : > { %6623 = vmatprep.subr.bf16.mxu1 %v7130_v16 }
0x1a31   : > { %6625 = vmatpush3.bf16.msra.mxu1 %v7130_v16 }
0x1a32   : > { %6627 = vmatprep.subr.bf16.mxu1 %v7141_v19 }
0x1af7   : > { %v6185_v51 = vpop.f32.mrb[24].mxu1 }
0x1af8   : > { %v3506_v52 = vpop.f32.mrb[25].mxu1 }
0x1af9   : > { %6208 = vmatprep.mubr.msk.f32.mxu1 %vm341_vm1, %v3506_v52 }
0x1afa   : > { %6209 = vmatmul.mubr.msk.f32.vlgmr.msra.gmra.mrb[28].mxu1 %vm341_vm1, %v6185_v51 }
0x1afb   : > { %6629 = vmatpush3.bf16.msra.mxu1 %v7141_v19  ;;  %v6188_v53 = vpop.f32.mrb[26].mxu1 }
0x1afc   : > { %6631 = vmatprep.subr.bf16.mxu1 %v7150_v24  ;;  %v3516_v57 = vpop.f32.mrb[27].mxu1 }
0x1afd   : > { %6219 = vmatprep.mubr.msk.f32.mxu1 %vm341_vm1, %v3516_v57  ;;  %v5447_v57 = vld [vmem:[%s7171_s7 + $0x98] sm:$0xff] }
0x1aff   : > { %6633 = vmatpush3.bf16.msra.mxu1 %v7150_v24 }
0x1b02   : > { %6220 = vmatmul.mubr.msk.f32.vlgmr.msra.gmra.mrb[28].mxu1 %vm341_vm1, %v6188_v53 }
0x1b03   : > { %6269 = vmatprep.mubr.msk.f32.mxu1 %vm241_vm0, %v7464_v4 }
0x1bd5   : > { %v6221_v62 = vpop.f32.mrb[28].mxu1 }
0x1bd6   : > { %v6798_v63 = vadd.f32 %v6221_v62, %v5431_v59  ;;  %v3764_v1 = vpop.f32.mrb[29].mxu1  ;;  %v5446_v59 = vld [vmem:[%s7171_s7 + $0x90] sm:$0xff] }
0x1bd7   : > { %v6799_v3 = vadd.f32 %v5430_v60, %v3764_v1 }
0x1bd8   : > { %v5439_v12 = vmul.f32 -1.442695, %v6798_v63 }
0x1bd9   : > { %v5438_v2 = vmul.f32 -1.442695, %v6799_v3 }
0x1bda   : > { %6963 = vpow2.f32 %v5439_v12 }
0x1bdb   : > { %6965 = vpow2.f32 %v5438_v2 }
0x1be4   : > { %v6964_v5 = vpop.eup %6963 }
0x1be5   : > { %v6966_v7 = vpop.eup %6965  ;;  %v3782_v8 = vadd.f32 1.0, %v6964_v5 }
0x1be6   : > { %v3781_v10 = vadd.f32 1.0, %v6966_v7 }
0x1be7   : > { %6967 = vrcp.f32 %v3782_v8 }
0x1be8   : > { %6969 = vrcp.f32 %v3781_v10 }
0x1bf1   : > { %v6968_v11 = vpop.eup %6967 }
0x1bf2   : > { %v6970_v14 = vpop.eup %6969  ;;  %v3788_v15 = vmul.f32 2.0, %v6968_v11  ;;  %v3792_v28 = vmul.f32 %v6968_v11, %v7543_v36 }
0x1bf3   : > { %v3787_v17 = vmul.f32 2.0, %v6970_v14  ;;  %v3791_v30 = vmul.f32 %v6970_v14, %v7545_v38 }
0x1bf4   : > { %v5441_v18 = vadd.f32 -1.0, %v3788_v15 }
0x1bf5   : > { %v5440_v21 = vadd.f32 -1.0, %v3787_v17 }
0x1bf6   : > { %3797 = vrot.lane.b32.xlu1 %v5441_v18, %s7024_s8 }
0x1bf7   : > { %3795 = vrot.lane.b32.xlu0 %v5440_v21, %s7024_s8 }
0x1c68   : > { %v3798_v23 = vpop.permute.xlu1 %3797 }
0x1c69   : > { %v3802_v25 = vmul.f32 %v6968_v11, %v3798_v23  ;;  %v3796_v26 = vpop.permute.xlu0 %3795 }
0x1c6a   : > { %v3801_v27 = vmul.f32 %v6970_v14, %v3796_v26 }
0x1c6b   : > { %3807 = vrot.lane.b32.xlu1 %v3802_v25, %s7025_s9 }
0x1c6c   : > { %3805 = vrot.lane.b32.xlu0 %v3801_v27, %s7025_s9 }
0x1c6f   : > { %3819 = vrot.lane.b32.xlu1 %v6968_v11, %s7024_s8 }
0x1c70   : > { %3817 = vrot.lane.b32.xlu0 %v6970_v14, %s7024_s8 }
0x1cdd   : > { %v3808_v29 = vpop.permute.xlu1 %3807 }
0x1cde   : > { %v7593_v31 = vadd.f32 %v3808_v29, %v3792_v28  ;;  %v3806_v33 = vpop.permute.xlu0 %3805 }
0x1cdf   : > { %v7595_v35 = vadd.f32 %v3806_v33, %v3791_v30 }
0x1ce0   : > { %6971 = vtanh.f32 %v7593_v31 }
0x1ce1   : > { %6973 = vtanh.f32 %v7595_v35  ;;  %v3820_v39 = vpop.permute.xlu1 %3819 }
0x1ce2   : > { %v3818_v44 = vpop.permute.xlu0 %3817 }
0x1cea   : > { %v6972_v37 = vpop.eup %6971 }
0x1ceb   : > { %v6974_v40 = vpop.eup %6973  ;;  %v3824_v41 = vmul.f32 %v6972_v37, %v3820_v39 }
0x1cec   : > { %v3823_v0 = vmul.f32 %v6974_v40, %v3818_v44 }
0x1ced   : > { %3829 = vrot.lane.b32.xlu1 %v3824_v41, %s7025_s9 }
0x1cee   : > { %3827 = vrot.lane.b32.xlu0 %v3823_v0, %s7025_s9 }
0x1d5f   : > { %v3830_v36 = vpop.permute.xlu1 %3829 }
0x1d60   : > { %3834 = vst.msk [vmem:[#allocation2 + $0x28] sm:$0xff] %vm341_vm1, %v3830_v36  ;;  %v3828_v38 = vpop.permute.xlu0 %3827 }
0x1d61   : > { %3833 = vst.msk [vmem:[#allocation2 + $0x10] sm:$0xff] %vm341_vm1, %v3828_v38  ;;  %v6634_v42 = vpack.c.bf16 %v3830_v36, %v3828_v38 }
0x1d63   : > { %6635 = vmatprep.subr.bf16.mxu0 %v6634_v42 }
0x1d64   : > { %6637 = vmatpush3.bf16.msra.mxu0 %v6634_v42 }
0x1d65   : > { %6639 = vmatprep.subr.bf16.mxu0 %v7088_v6 }
0x1d67   : > { %6227 = vmatmul.mubr.msk.f32.vlgmr.msra.gmra.mrb[24].mxu0 %vm241_vm0, %v7496_v54 }
0x1d68   : > { %6641 = vmatpush3.bf16.msra.mxu0 %v7088_v6  ;;  %6229 = vmatprep.mubr.msk.f32.mxu0 %vm241_vm0, %v7504_v55 }
0x1d69   : > { %6643 = vmatprep.subr.bf16.mxu0 %v7100_v9 }
0x1d6b   : > { %6230 = vmatmul.mubr.msk.f32.gmra.mrb[26].mxu0 %vm241_vm0, %v7512_v56 }
0x1d6c   : > { %6645 = vmatpush3.bf16.msra.mxu0 %v7100_v9  ;;  %6240 = vmatprep.mubr.msk.f32.mxu0 %vm341_vm1, %v3828_v38 }
0x1d6d   : > { %6647 = vmatprep.subr.bf16.mxu0 %v7118_v13 }
0x1d6f   : > { %6241 = vmatmul.mubr.msk.f32.vlgmr.msra.gmra.mrb[28].mxu0 %vm341_vm1, %v3830_v36 }
0x1d70   : > { %6649 = vmatpush3.bf16.msra.mxu0 %v7118_v13 }
0x1d71   : > { %6651 = vmatprep.subr.bf16.mxu0 %v7130_v16 }
0x1d74   : > { %6653 = vmatpush3.bf16.msra.mxu0 %v7130_v16 }
0x1d75   : > { %6655 = vmatprep.subr.bf16.mxu0 %v7141_v19 }
0x1e3a   : > { %v6228_v49 = vpop.f32.mrb[24].mxu0 }
0x1e3b   : > { %v3901_v51 = vpop.f32.mrb[25].mxu0 }
0x1e3c   : > { %6251 = vmatprep.mubr.msk.f32.mxu0 %vm341_vm1, %v3901_v51 }
0x1e3d   : > { %6252 = vmatmul.mubr.msk.f32.vlgmr.msra.gmra.mrb[28].mxu0 %vm341_vm1, %v6228_v49 }
0x1e3e   : > { %6657 = vmatpush3.bf16.msra.mxu0 %v7141_v19  ;;  %v6231_v52 = vpop.f32.mrb[26].mxu0 }
0x1e3f   : > { %6659 = vmatprep.subr.bf16.mxu0 %v7150_v24  ;;  %v3911_v53 = vpop.f32.mrb[27].mxu0 }
0x1e40   : > { %6262 = vmatprep.mubr.msk.f32.mxu0 %vm341_vm1, %v3911_v53  ;;  %v5462_v53 = vld [vmem:[%s7171_s7 + $0xa0] sm:$0xff] }
0x1e42   : > { %6661 = vmatpush3.bf16.msra.mxu0 %v7150_v24 }
0x1e45   : > { %6263 = vmatmul.mubr.msk.f32.vlgmr.msra.gmra.mrb[28].mxu0 %vm341_vm1, %v6231_v52  ;;  %v5463_v52 = vld [vmem:[%s7171_s7 + $0xa8] sm:$0xff] }
0x1e46   : > { %6312 = vmatprep.mubr.msk.f32.mxu0 %vm241_vm0, %v7464_v4 }
0x1f18   : > { %v6264_v60 = vpop.f32.mrb[28].mxu0 }
0x1f19   : > { %v6800_v62 = vadd.f32 %v6264_v60, %v5447_v57  ;;  %v4159_v63 = vpop.f32.mrb[29].mxu0 }
0x1f1a   : > { %v6801_v1 = vadd.f32 %v5446_v59, %v4159_v63 }
0x1f1b   : > { %v5455_v3 = vmul.f32 -1.442695, %v6800_v62 }
0x1f1c   : > { %v5454_v12 = vmul.f32 -1.442695, %v6801_v1 }
0x1f1d   : > { %6975 = vpow2.f32 %v5455_v3 }
0x1f1e   : > { %6977 = vpow2.f32 %v5454_v12 }
0x1f27   : > { %v6976_v2 = vpop.eup %6975 }
0x1f28   : > { %v6978_v5 = vpop.eup %6977  ;;  %v4177_v7 = vadd.f32 1.0, %v6976_v2 }
0x1f29   : > { %v4176_v8 = vadd.f32 1.0, %v6978_v5 }
0x1f2a   : > { %6979 = vrcp.f32 %v4177_v7 }
0x1f2b   : > { %6981 = vrcp.f32 %v4176_v8 }
0x1f34   : > { %v6980_v10 = vpop.eup %6979 }
0x1f35   : > { %v6982_v11 = vpop.eup %6981  ;;  %v4183_v14 = vmul.f32 2.0, %v6980_v10  ;;  %v4187_v26 = vmul.f32 %v6980_v10, %v7593_v31 }
0x1f36   : > { %v4182_v4 = vmul.f32 2.0, %v6982_v11  ;;  %v4186_v28 = vmul.f32 %v6982_v11, %v7595_v35 }
0x1f37   : > { %v5457_v15 = vadd.f32 -1.0, %v4183_v14 }
0x1f38   : > { %v5456_v17 = vadd.f32 -1.0, %v4182_v4 }
0x1f39   : > { %4192 = vrot.lane.b32.xlu1 %v5457_v15, %s7024_s8 }
0x1f3a   : > { %4190 = vrot.lane.b32.xlu0 %v5456_v17, %s7024_s8 }
0x1fab   : > { %v4193_v18 = vpop.permute.xlu1 %4192 }
0x1fac   : > { %v4197_v21 = vmul.f32 %v6980_v10, %v4193_v18  ;;  %v4191_v23 = vpop.permute.xlu0 %4190 }
0x1fad   : > { %v4196_v25 = vmul.f32 %v6982_v11, %v4191_v23 }
0x1fae   : > { %4202 = vrot.lane.b32.xlu1 %v4197_v21, %s7025_s9 }
0x1faf   : > { %4200 = vrot.lane.b32.xlu0 %v4196_v25, %s7025_s9 }
0x1fb2   : > { %4214 = vrot.lane.b32.xlu1 %v6980_v10, %s7024_s8 }
0x1fb3   : > { %4212 = vrot.lane.b32.xlu0 %v6982_v11, %s7024_s8 }
0x2020   : > { %v4203_v27 = vpop.permute.xlu1 %4202 }
0x2021   : > { %v7639_v29 = vadd.f32 %v4203_v27, %v4187_v26  ;;  %v4201_v30 = vpop.permute.xlu0 %4200 }
0x2022   : > { %v7641_v33 = vadd.f32 %v4201_v30, %v4186_v28 }
0x2023   : > { %6983 = vtanh.f32 %v7639_v29 }
0x2024   : > { %6985 = vtanh.f32 %v7641_v33  ;;  %v4215_v39 = vpop.permute.xlu1 %4214 }
0x2025   : > { %v4213_v44 = vpop.permute.xlu0 %4212 }
0x202d   : > { %v6984_v37 = vpop.eup %6983 }
0x202e   : > { %v6986_v40 = vpop.eup %6985  ;;  %v7645_v41 = vmul.f32 %v6984_v37, %v4215_v39 }
0x202f   : > { %v7647_v0 = vmul.f32 %v6986_v40, %v4213_v44 }
0x2030   : > { %4232 = vrot.lane.b32.xlu1 %v7645_v41, %s7025_s9 }
0x2031   : > { %4230 = vrot.lane.b32.xlu0 %v7647_v0, %s7025_s9 }
0x20a2   : > { %v4233_v31 = vpop.permute.xlu1 %4232 }
0x20a3   : > { %v4231_v35 = vpop.permute.xlu0 %4230 }
0x20a4   : > { %v6662_v36 = vpack.c.bf16 %v4233_v31, %v4231_v35 }
0x20a6   : > { %6663 = vmatprep.subr.bf16.mxu1 %v6662_v36 }
0x20a7   : > { %6665 = vmatpush3.bf16.msra.mxu1 %v6662_v36 }
0x20a8   : > { %6667 = vmatprep.subr.bf16.mxu1 %v7088_v6 }
0x20aa   : > { %6270 = vmatmul.mubr.msk.f32.vlgmr.msra.gmra.mrb[30].mxu1 %vm241_vm0, %v7496_v54 }
0x20ab   : > { %6669 = vmatpush3.bf16.msra.mxu1 %v7088_v6  ;;  %6272 = vmatprep.mubr.msk.f32.mxu1 %vm241_vm0, %v7504_v55 }
0x20ac   : > { %6671 = vmatprep.subr.bf16.mxu1 %v7100_v9 }
0x20ae   : > { %6273 = vmatmul.mubr.msk.f32.gmra.mrb[32].mxu1 %vm241_vm0, %v7512_v56 }
0x20af   : > { %6673 = vmatpush3.bf16.msra.mxu1 %v7100_v9  ;;  %6283 = vmatprep.mubr.msk.f32.mxu1 %vm341_vm1, %v4231_v35 }
0x20b0   : > { %6675 = vmatprep.subr.bf16.mxu1 %v7118_v13 }
0x20b2   : > { %6284 = vmatmul.mubr.msk.f32.vlgmr.msra.gmra.mrb[34].mxu1 %vm341_vm1, %v4233_v31 }
0x20b3   : > { %6677 = vmatpush3.bf16.msra.mxu1 %v7118_v13 }
0x20b4   : > { %6679 = vmatprep.subr.bf16.mxu1 %v7130_v16 }
0x20b7   : > { %6681 = vmatpush3.bf16.msra.mxu1 %v7130_v16 }
0x20b8   : > { %6683 = vmatprep.subr.bf16.mxu1 %v7141_v19 }
0x217d   : > { %v6271_v38 = vpop.f32.mrb[30].mxu1 }
0x217e   : > { %v4302_v42 = vpop.f32.mrb[31].mxu1 }
0x217f   : > { %6294 = vmatprep.mubr.msk.f32.mxu1 %vm341_vm1, %v4302_v42 }
0x2180   : > { %6295 = vmatmul.mubr.msk.f32.vlgmr.msra.gmra.mrb[34].mxu1 %vm341_vm1, %v6271_v38 }
0x2181   : > { %6685 = vmatpush3.bf16.msra.mxu1 %v7141_v19  ;;  %v6274_v49 = vpop.f32.mrb[32].mxu1 }
0x2182   : > { %6687 = vmatprep.subr.bf16.mxu1 %v7150_v24  ;;  %v4312_v51 = vpop.f32.mrb[33].mxu1 }
0x2183   : > { %6305 = vmatprep.mubr.msk.f32.mxu1 %vm341_vm1, %v4312_v51 }
0x2185   : > { %6689 = vmatpush3.bf16.msra.mxu1 %v7150_v24 }
0x2188   : > { %6306 = vmatmul.mubr.msk.f32.vlgmr.msra.gmra.mrb[34].mxu1 %vm341_vm1, %v6274_v49 }
0x225b   : > { %v6307_v57 = vpop.f32.mrb[34].mxu1 }
0x225c   : > { %v6802_v59 = vadd.f32 %v6307_v57, %v5463_v52  ;;  %v4560_v60 = vpop.f32.mrb[35].mxu1 }
0x225d   : > { %v6803_v62 = vadd.f32 %v5462_v53, %v4560_v60 }
0x225e   : > { %v5471_v63 = vmul.f32 -1.442695, %v6802_v59 }
0x225f   : > { %v5470_v1 = vmul.f32 -1.442695, %v6803_v62 }
0x2260   : > { %6987 = vpow2.f32 %v5471_v63 }
0x2261   : > { %6989 = vpow2.f32 %v5470_v1 }
0x226a   : > { %v6988_v3 = vpop.eup %6987 }
0x226b   : > { %v6990_v12 = vpop.eup %6989  ;;  %v4578_v2 = vadd.f32 1.0, %v6988_v3 }
0x226c   : > { %v4577_v5 = vadd.f32 1.0, %v6990_v12  ;;  %v5048_v12 = vld [vmem:[%s7950_s3 + $0x80] sm:$0xff] }
0x226d   : > { %6991 = vrcp.f32 %v4578_v2  ;;  %v5049_v2 = vld [vmem:[%s7950_s3 + $0x88] sm:$0xff] }
0x226e   : > { %6993 = vrcp.f32 %v4577_v5  ;;  %v5032_v5 = vld [vmem:[%s7950_s3] sm:$0xff] }
0x2277   : > { %v6992_v7 = vpop.eup %6991 }
0x2278   : > { %v6994_v8 = vpop.eup %6993  ;;  %v4584_v10 = vmul.f32 2.0, %v6992_v7  ;;  %v4588_v23 = vmul.f32 %v6992_v7, %v7639_v29 }
0x2279   : > { %v4583_v11 = vmul.f32 2.0, %v6994_v8  ;;  %v4587_v26 = vmul.f32 %v6994_v8, %v7641_v33 }
0x227a   : > { %v5473_v14 = vadd.f32 -1.0, %v4584_v10  ;;  %v5050_v10 = vld [vmem:[%s7950_s3 + $0x90] sm:$0xff] }
0x227b   : > { %v5472_v4 = vadd.f32 -1.0, %v4583_v11  ;;  %v5051_v11 = vld [vmem:[%s7950_s3 + $0x98] sm:$0xff] }
0x227c   : > { %4593 = vrot.lane.b32.xlu1 %v5473_v14, %s7024_s8 }
0x227d   : > { %4591 = vrot.lane.b32.xlu0 %v5472_v4, %s7024_s8  ;;  %v6722_v4 = vpack.c.bf16 %v5051_v11, %v5050_v10  ;;  %v5046_v10 = vld [vmem:[%s7950_s3 + $0x70] sm:$0xff]  ;;  %v5047_v11 = vld [vmem:[%s7950_s3 + $0x78] sm:$0xff] }
0x22ee   : > { %v4594_v15 = vpop.permute.xlu1 %4593 }
0x22ef   : > { %v4598_v17 = vmul.f32 %v6992_v7, %v4594_v15  ;;  %v4592_v18 = vpop.permute.xlu0 %4591  ;;  %v5034_v15 = vld [vmem:[%s7950_s3 + $0x10] sm:$0xff] }
0x22f0   : > { %v4597_v21 = vmul.f32 %v6994_v8, %v4592_v18  ;;  %v5052_v18 = vld [vmem:[%s7950_s3 + $0xa0] sm:$0xff] }
0x22f1   : > { %4603 = vrot.lane.b32.xlu1 %v4598_v17, %s7025_s9  ;;  %v5035_v17 = vld [vmem:[%s7950_s3 + $0x18] sm:$0xff] }
0x22f2   : > { %4601 = vrot.lane.b32.xlu0 %v4597_v21, %s7025_s9  ;;  %v5053_v21 = vld [vmem:[%s7950_s3 + $0xa8] sm:$0xff] }
0x22f5   : > { %4615 = vrot.lane.b32.xlu1 %v6992_v7, %s7024_s8  ;;  %v6718_v7 = vpack.c.bf16 %v5049_v2, %v5048_v12  ;;  %v5045_v12 = vld [vmem:[%s7950_s3 + $0x68] sm:$0xff] }
0x22f6   : > { %4613 = vrot.lane.b32.xlu0 %v6994_v8, %s7024_s8  ;;  %v5033_v8 = vld [vmem:[%s7950_s3 + $0x8] sm:$0xff] }
0x22f7   : > { %v6720_v14 = vpack.c.bf16 %v5033_v8, %v5032_v5  ;;  %6719 = vmatprep.subr.bf16.mxu1 %v6718_v7  ;;  %v5062_v5 = vld [vmem:[%s7950_s3 + $0xf0] sm:$0xff]  ;;  %v5063_v7 = vld [vmem:[%s7950_s3 + $0xf8] sm:$0xff] }
0x22f8   : > { %v6746_v8 = vpack.c.bf16 %v5063_v7, %v5062_v5 }
0x22f9   : > { %6721 = vmatpush3.bf16.msra.mxu1 %v6720_v14  ;;  %v6748_v14 = vpack.c.bf16 %v5047_v11, %v5046_v10 }
0x22fa   : > { %6723 = vmatprep.subr.bf16.mxu1 %v6722_v4 }
0x2363   : > { %v4604_v25 = vpop.permute.xlu1 %4603 }
0x2364   : > { %v7687_v27 = vadd.f32 %v4604_v25, %v4588_v23  ;;  %v4602_v28 = vpop.permute.xlu0 %4601  ;;  %v6724_v23 = vpack.c.bf16 %v5035_v17, %v5034_v15  ;;  %v6726_v25 = vpack.c.bf16 %v5053_v21, %v5052_v18  ;;  %v5069_v15 = vld [vmem:[%s7950_s3 + $0x128] sm:$0xff]  ;;  %v5070_v18 = vld [vmem:[%s7950_s3 + $0x130] sm:$0xff]  ;;  %v5071_v21 = vld [vmem:[%s7950_s3 + $0x138] sm:$0xff] }
0x2365   : > { %v7689_v30 = vadd.f32 %v4602_v28, %v4587_v26  ;;  %v5036_v26 = vld [vmem:[%s7950_s3 + $0x20] sm:$0xff]  ;;  %v5037_v28 = vld [vmem:[%s7950_s3 + $0x28] sm:$0xff] }
0x2366   : > { %6995 = vtanh.f32 %v7687_v27  ;;  %6725 = vmatpush3.bf16.msra.mxu1 %v6724_v23  ;;  %v5073_v23 = vld [vmem:[%s7950_s3 + $0x148] sm:$0xff] }
0x2367   : > { %6997 = vtanh.f32 %v7689_v30  ;;  %v4616_v39 = vpop.permute.xlu1 %4615  ;;  %6727 = vmatprep.subr.bf16.mxu1 %v6726_v25 }
0x2368   : > { %v4614_v31 = vpop.permute.xlu0 %4613 }
0x2370   : > { %v6996_v37 = vpop.eup %6995 }
0x2371   : > { %v6998_v40 = vpop.eup %6997  ;;  %v7693_v44 = vmul.f32 %v6996_v37, %v4616_v39  ;;  %v6728_v37 = vpack.c.bf16 %v5037_v28, %v5036_v26  ;;  %v5054_v39 = vld [vmem:[%s7950_s3 + $0xb0] sm:$0xff] }
0x2372   : > { %v7695_v35 = vmul.f32 %v6998_v40, %v4614_v31  ;;  %v5055_v40 = vld [vmem:[%s7950_s3 + $0xb8] sm:$0xff] }
0x2373   : > { %4627 = vrot.lane.b32.xlu1 %v7693_v44, %s7025_s9  ;;  %6729 = vmatpush3.bf16.msra.mxu1 %v6728_v37  ;;  %v6730_v31 = vpack.c.bf16 %v5055_v40, %v5054_v39 }
0x2374   : > { %4625 = vrot.lane.b32.xlu0 %v7695_v35, %s7025_s9 }
0x2375   : > { %6731 = vmatprep.subr.bf16.mxu1 %v6730_v31 }
0x23e5   : > { %v4628_v29 = vpop.permute.xlu1 %4627 }
0x23e6   : > { %v4626_v33 = vpop.permute.xlu0 %4625 }
0x23e7   : > { %v6690_v36 = vpack.c.bf16 %v4628_v29, %v4626_v33 }
0x23e9   : > { %6691 = vmatprep.subr.bf16.mxu0 %v6690_v36 }
0x23ea   : > { %6693 = vmatpush3.bf16.msra.mxu0 %v6690_v36 }
0x23eb   : > { %6695 = vmatprep.subr.bf16.mxu0 %v7088_v6 }
0x23ed   : > { %6313 = vmatmul.mubr.msk.f32.vlgmr.msra.gmra.mrb[30].mxu0 %vm241_vm0, %v7496_v54 }
0x23ee   : > { %6697 = vmatpush3.bf16.msra.mxu0 %v7088_v6  ;;  %6315 = vmatprep.mubr.msk.f32.mxu0 %vm241_vm0, %v7504_v55 }
0x23ef   : > { %6699 = vmatprep.subr.bf16.mxu0 %v7100_v9 }
0x23f1   : > { %6316 = vmatmul.mubr.msk.f32.gmra.mrb[32].mxu0 %vm241_vm0, %v7512_v56 }
0x23f2   : > { %6701 = vmatpush3.bf16.msra.mxu0 %v7100_v9  ;;  %6326 = vmatprep.mubr.msk.f32.mxu0 %vm341_vm1, %v4626_v33  ;;  %v5039_v33 = vld [vmem:[%s7950_s3 + $0x38] sm:$0xff] }
0x23f3   : > { %6703 = vmatprep.subr.bf16.mxu0 %v7118_v13 }
0x23f5   : > { %6327 = vmatmul.mubr.msk.f32.vlgmr.msra.gmra.mrb[34].mxu0 %vm341_vm1, %v4628_v29  ;;  %v5038_v29 = vld [vmem:[%s7950_s3 + $0x30] sm:$0xff] }
0x23f6   : > { %6705 = vmatpush3.bf16.msra.mxu0 %v7118_v13  ;;  %v5479_v13 = vld [vmem:[%s7171_s7 + $0xb8] sm:$0xff]  ;;  %v6732_v36 = vpack.c.bf16 %v5039_v33, %v5038_v29  ;;  %v5076_v33 = vld [vmem:[%s7950_s3 + $0x160] sm:$0xff] }
0x23f7   : > { %6707 = vmatprep.subr.bf16.mxu0 %v7130_v16 }
0x23f8   : > { %6733 = vmatpush3.bf16.msra.mxu1 %v6732_v36  ;;  %v5077_v36 = vld [vmem:[%s7950_s3 + $0x168] sm:$0xff] }
0x23fa   : > { %6709 = vmatpush3.bf16.msra.mxu0 %v7130_v16  ;;  %v5478_v16 = vld [vmem:[%s7171_s7 + $0xb0] sm:$0xff] }
0x23fb   : > { %6711 = vmatprep.subr.bf16.mxu0 %v7141_v19 }
0x24c0   : > { %v6314_v6 = vpop.f32.mrb[30].mxu0 }
0x24c1   : > { %v4697_v54 = vpop.f32.mrb[31].mxu0 }
0x24c2   : > { %6337 = vmatprep.mubr.msk.f32.mxu0 %vm341_vm1, %v4697_v54  ;;  %v5057_v54 = vld [vmem:[%s7950_s3 + $0xc8] sm:$0xff] }
0x24c3   : > { %6338 = vmatmul.mubr.msk.f32.vlgmr.msra.gmra.mrb[34].mxu0 %vm341_vm1, %v6314_v6  ;;  %v5056_v6 = vld [vmem:[%s7950_s3 + $0xc0] sm:$0xff] }
0x24c4   : > { %6713 = vmatpush3.bf16.msra.mxu0 %v7141_v19  ;;  %v6317_v9 = vpop.f32.mrb[32].mxu0 }
0x24c5   : > { %6715 = vmatprep.subr.bf16.mxu0 %v7150_v24  ;;  %v4707_v55 = vpop.f32.mrb[33].mxu0 }
0x24c6   : > { %6348 = vmatprep.mubr.msk.f32.mxu0 %vm341_vm1, %v4707_v55  ;;  %v5040_v55 = vld [vmem:[%s7950_s3 + $0x40] sm:$0xff] }
0x24c8   : > { %6717 = vmatpush3.bf16.msra.mxu0 %v7150_v24 }
0x24cb   : > { %6349 = vmatmul.mubr.msk.f32.vlgmr.msra.gmra.mrb[34].mxu0 %vm341_vm1, %v6317_v9  ;;  %v6734_v9 = vpack.c.bf16 %v5057_v54, %v5056_v6  ;;  %v6774_v6 = vpack.c.bf16 %v5077_v36, %v5076_v33 }
0x24cd   : > { %6735 = vmatprep.subr.bf16.mxu1 %v6734_v9 }
0x259e   : > { %v6350_v56 = vpop.f32.mrb[34].mxu0 }
0x259f   : > { %v6804_v38 = vadd.f32 %v6350_v56, %v5479_v13  ;;  %v4955_v42 = vpop.f32.mrb[35].mxu0  ;;  %v5041_v13 = vld [vmem:[%s7950_s3 + $0x48] sm:$0xff]  ;;  %v5058_v56 = vld [vmem:[%s7950_s3 + $0xd0] sm:$0xff] }
0x25a0   : > { %v6805_v49 = vadd.f32 %v5478_v16, %v4955_v42  ;;  %v6736_v16 = vpack.c.bf16 %v5041_v13, %v5040_v55 }
0x25a1   : > { %v5487_v51 = vmul.f32 -1.442695, %v6804_v38  ;;  %v5059_v38 = vld [vmem:[%s7950_s3 + $0xd8] sm:$0xff] }
0x25a2   : > { %v5486_v52 = vmul.f32 -1.442695, %v6805_v49  ;;  %6737 = vmatpush3.bf16.msra.mxu1 %v6736_v16  ;;  %v6738_v42 = vpack.c.bf16 %v5059_v38, %v5058_v56  ;;  %v5042_v49 = vld [vmem:[%s7950_s3 + $0x50] sm:$0xff] }
0x25a3   : > { %6999 = vpow2.f32 %v5487_v51  ;;  %v5043_v51 = vld [vmem:[%s7950_s3 + $0x58] sm:$0xff] }
0x25a4   : > { %7001 = vpow2.f32 %v5486_v52  ;;  %v6740_v52 = vpack.c.bf16 %v5043_v51, %v5042_v49  ;;  %6739 = vmatprep.subr.bf16.mxu1 %v6738_v42 }
0x25a6   : > { %6741 = vmatpush3.bf16.msra.mxu1 %v6740_v52 }
0x25ad   : > { %v7000_v19 = vpop.eup %6999 }
0x25ae   : > { %v7002_v53 = vpop.eup %7001  ;;  %v4973_v57 = vadd.f32 1.0, %v7000_v19 }
0x25af   : > { %v4972_v59 = vadd.f32 1.0, %v7002_v53 }
0x25b0   : > { %7003 = vrcp.f32 %v4973_v57 }
0x25b1   : > { %7005 = vrcp.f32 %v4972_v59  ;;  %v5060_v59 = vld [vmem:[%s7950_s3 + $0xe0] sm:$0xff] }
0x25ba   : > { %v7727_v60 = vpop.eup %7003 }
0x25bb   : > { %v7729_v24 = vpop.eup %7005  ;;  %v4979_v62 = vmul.f32 2.0, %v7727_v60  ;;  %v4983_v28 = vmul.f32 %v7727_v60, %v7687_v27  ;;  %v5078_v27 = vld [vmem:[%s7950_s3 + $0x170] sm:$0xff] }
0x25bc   : > { %v4978_v63 = vmul.f32 2.0, %v7729_v24  ;;  %v4982_v39 = vmul.f32 %v7729_v24, %v7689_v30  ;;  %v5079_v30 = vld [vmem:[%s7950_s3 + $0x178] sm:$0xff] }
0x25bd   : > { %v5489_v1 = vadd.f32 -1.0, %v4979_v62  ;;  %v5061_v62 = vld [vmem:[%s7950_s3 + $0xe8] sm:$0xff] }
0x25be   : > { %v5488_v3 = vadd.f32 -1.0, %v4978_v63 }
0x25bf   : > { %4988 = vrot.lane.b32.xlu1 %v5489_v1, %s7024_s8  ;;  %v6742_v1 = vpack.c.bf16 %v5061_v62, %v5060_v59 }
0x25c0   : > { %4986 = vrot.lane.b32.xlu0 %v5488_v3, %s7024_s8  ;;  %v5044_v3 = vld [vmem:[%s7950_s3 + $0x60] sm:$0xff] }
0x25c1   : > { %v6744_v2 = vpack.c.bf16 %v5045_v12, %v5044_v3  ;;  %6743 = vmatprep.subr.bf16.mxu1 %v6742_v1 }
0x25c3   : > { %6745 = vmatpush3.bf16.msra.mxu1 %v6744_v2 }
0x25c4   : > { %6747 = vmatprep.subr.bf16.mxu1 %v6746_v8  ;;  %v5490_v8 = vld [vmem:[%s7951_s4] ss:$0 sm:$0xff] }
0x25c7   : > { %6749 = vmatpush3.bf16.msra.mxu1 %v6748_v14 }
0x2631   : > { %v4989_v19 = vpop.permute.xlu1 %4988 }
0x2632   : > { %v4993_v53 = vmul.f32 %v7727_v60, %v4989_v19  ;;  %v4987_v57 = vpop.permute.xlu0 %4986 }
0x2633   : > { %v4992_v63 = vmul.f32 %v7729_v24, %v4987_v57 }
0x2634   : > { %4998 = vrot.lane.b32.xlu1 %v4993_v53, %s7025_s9 }
0x2635   : > { %4996 = vrot.lane.b32.xlu0 %v4992_v63, %s7025_s9  ;;  %s7026_s9 = smov 32  }
0x2638   : > { %5010 = vrot.lane.b32.xlu1 %v7727_v60, %s7024_s8 }
0x2639   : > { %5008 = vrot.lane.b32.xlu0 %v7729_v24, %s7024_s8  ;;  %v6778_v24 = vpack.c.bf16 %v5079_v30, %v5078_v27 }
0x263c   : > { %1035 = vrot.lane.b32.xlu1 %v7235_v47, %s7024_s8  ;;  %v5064_v47 = vld [vmem:[%s7950_s3 + $0x100] sm:$0xff] }
0x263d   : > { %2630 = vrot.lane.b32.xlu0 %v7431_v61, %s7024_s8  ;;  %v5065_v61 = vld [vmem:[%s7950_s3 + $0x108] sm:$0xff] }
0x263e   : > { %v6750_v4 = vpack.c.bf16 %v5065_v61, %v5064_v47 }
0x2640   : > { %1833 = vrot.lane.b32.xlu1 %v7335_v22, %s7026_s9  ;;  %v5066_v22 = vld [vmem:[%s7950_s3 + $0x110] sm:$0xff]  ;;  %6751 = vmatprep.subr.bf16.mxu0 %v6750_v4 }
0x2641   : > { %3426 = vrot.lane.b32.xlu0 %v7551_v46, %s7026_s9  ;;  %6753 = vmatpush3.bf16.msra.mxu0 %v6750_v4 }
0x2644   : > { %1037 = vrot.lane.b32.xlu1 %v7233_v45, %s7024_s8  ;;  %v5067_v45 = vld [vmem:[%s7950_s3 + $0x118] sm:$0xff] }
0x2645   : > { %2632 = vrot.lane.b32.xlu0 %v7429_v58, %s7024_s8  ;;  %v6754_v46 = vpack.c.bf16 %v5067_v45, %v5066_v22  ;;  %v5068_v58 = vld [vmem:[%s7950_s3 + $0x120] sm:$0xff] }
0x2646   : > { %v6758_v17 = vpack.c.bf16 %v5069_v15, %v5068_v58 }
0x2647   : > { %6755 = vmatprep.subr.bf16.mxu0 %v6754_v46 }
0x2648   : > { %1835 = vrot.lane.b32.xlu1 %v7333_v20, %s7026_s9  ;;  %6757 = vmatpush3.bf16.msra.mxu0 %v6754_v46  ;;  %v6762_v20 = vpack.c.bf16 %v5071_v21, %v5070_v18 }
0x2649   : > { %3428 = vrot.lane.b32.xlu0 %v7549_v43, %s7026_s9  ;;  %6759 = vmatprep.subr.bf16.mxu0 %v6758_v17  ;;  %v5072_v43 = vld [vmem:[%s7950_s3 + $0x140] sm:$0xff] }
0x264a   : > { %v6766_v25 = vpack.c.bf16 %v5073_v23, %v5072_v43 }
0x264c   : > { %4224 = vrot.lane.b32.xlu1 %v7645_v41, %s7024_s8  ;;  %6761 = vmatpush3.bf16.msra.mxu0 %v6758_v17  ;;  %v5074_v41 = vld [vmem:[%s7950_s3 + $0x150] sm:$0xff] }
0x264d   : > { %4222 = vrot.lane.b32.xlu0 %v7647_v0, %s7024_s8  ;;  %6763 = vmatprep.subr.bf16.mxu0 %v6762_v20  ;;  %v5075_v0 = vld [vmem:[%s7950_s3 + $0x158] sm:$0xff] }
0x264e   : > { %v6770_v26 = vpack.c.bf16 %v5075_v0, %v5074_v41 }
0x2650   : > { %6765 = vmatpush3.bf16.msra.mxu0 %v6762_v20 }
0x2651   : > { %6767 = vmatprep.subr.bf16.mxu0 %v6766_v25 }
0x2654   : > { %6769 = vmatpush3.bf16.msra.mxu0 %v6766_v25 }
0x2655   : > { %6771 = vmatprep.subr.bf16.mxu0 %v6770_v26 }
0x2658   : > { %6773 = vmatpush3.bf16.msra.mxu0 %v6770_v26 }
0x2659   : > { %6775 = vmatprep.subr.bf16.mxu0 %v6774_v6 }
0x265c   : > { %6777 = vmatpush3.bf16.msra.mxu0 %v6774_v6 }
0x265d   : > { %6779 = vmatprep.subr.bf16.mxu0 %v6778_v24 }
0x2660   : > { %6781 = vmatpush3.bf16.msra.mxu0 %v6778_v24 }
0x26a6   : > { %v4999_v37 = vpop.permute.xlu1 %4998 }
0x26a7   : > { %v5003_v40 = vadd.f32 %v4999_v37, %v4983_v28  ;;  %v4997_v31 = vpop.permute.xlu0 %4996 }
0x26a8   : > { %v5002_v29 = vadd.f32 %v4997_v31, %v4982_v39 }
0x26a9   : > { %7007 = vtanh.f32 %v5003_v40 }
0x26aa   : > { %7009 = vtanh.f32 %v5002_v29  ;;  %v5011_v54 = vpop.permute.xlu1 %5010 }
0x26ab   : > { %v5009_v60 = vpop.permute.xlu0 %5008 }
0x26ae   : > { %v1036_v9 = vpop.permute.xlu1 %1035 }
0x26af   : > { %1042 = vst.msk [vmem:[#allocation2] sm:$0xff] %vm1041_vm2, %v1036_v9  ;;  %v2631_v55 = vpop.permute.xlu0 %2630 }
0x26b0   : > { %2636 = vst.msk [vmem:[#allocation2 + $0x8] sm:$0xff] %vm1041_vm2, %v2631_v55 }
0x26b1   : > { %1436 = vst.msk [vmem:[#allocation2] sm:$0xff] %vm1435_vm3, %v7285_v34  ;;  %3029 = vst.msk [vmem:[#allocation2 + $0x8] sm:$0xff] %vm1435_vm3, %v7486_v50 }
0x26b2   : > { %v1834_v13 = vpop.permute.xlu1 %1833 }
0x26b3   : > { %v7008_v16 = vpop.eup %7007  ;;  %1840 = vst.msk [vmem:[#allocation2] sm:$0xff] %vm1839_vm4, %v1834_v13  ;;  %v3427_v56 = vpop.permute.xlu0 %3426 }
0x26b4   : > { %v7010_v38 = vpop.eup %7009  ;;  %v5015_v42 = vmul.f32 %v7008_v16, %v5011_v54  ;;  %3432 = vst.msk [vmem:[#allocation2 + $0x8] sm:$0xff] %vm1839_vm4, %v3427_v56 }
0x26b5   : > { %v5014_v49 = vmul.f32 %v7010_v38, %v5009_v60 }
0x26b6   : > { %5020 = vrot.lane.b32.xlu1 %v5015_v42, %s7026_s9  ;;  %v1038_v51 = vpop.permute.xlu1 %1037 }
0x26b7   : > { %1043 = vst.msk [vmem:[#allocation2 + $0x18] sm:$0xff] %vm1041_vm2, %v1038_v51  ;;  %5018 = vrot.lane.b32.xlu0 %v5014_v49, %s7026_s9  ;;  %v2633_v34 = vpop.permute.xlu0 %2632  ;;  %s5493_s9 = sshll.u32 %s7954_s19, 4 }
0x26b8   : > { %1437 = vst.msk [vmem:[#allocation2 + $0x18] sm:$0xff] %vm1435_vm3, %v7283_v32  ;;  %s224_s12 = scalar_lea.vmem %s7952_s5, %s5493_s9 }
0x26b9   : > { %2637 = vst.msk [vmem:[#allocation2 + $0x20] sm:$0xff] %vm1041_vm2, %v2633_v34 }
0x26ba   : > { %3030 = vst.msk [vmem:[#allocation2 + $0x20] sm:$0xff] %vm1435_vm3, %v7484_v48  ;;  %v1836_v50 = vpop.permute.xlu1 %1835  ;;  %v5026_v53 = vld [vmem:[#allocation2] sm:$0xff] }
0x26bb   : > { %1841 = vst.msk [vmem:[#allocation2 + $0x18] sm:$0xff] %vm1839_vm4, %v1836_v50  ;;  %v3429_v52 = vpop.permute.xlu0 %3428  ;;  %v5027_v19 = vld [vmem:[#allocation2 + $0x8] sm:$0xff] }
0x26bc   : > { %3433 = vst.msk [vmem:[#allocation2 + $0x20] sm:$0xff] %vm1839_vm4, %v3429_v52  ;;  %5151 = vmatprep.mubr.f32.mxu1 %v5027_v19 }
0x26bd   : > { %5152 = vmatmul.mubr.f32.vlgmr.msra.gmra.mrb[36].mxu1 %v5026_v53 }
0x26be   : > { %v4225_v57 = vpop.permute.xlu1 %4224 }
0x26bf   : > { %4229 = vst.msk [vmem:[#allocation2 + $0x28] sm:$0xff] %vm1041_vm2, %v4225_v57  ;;  %v4223_v59 = vpop.permute.xlu0 %4222 }
0x26c0   : > { %4622 = vst.msk [vmem:[#allocation2 + $0x28] sm:$0xff] %vm1435_vm3, %v7693_v44 }
0x26c1   : > { %4228 = vst.msk [vmem:[#allocation2 + $0x10] sm:$0xff] %vm1041_vm2, %v4223_v59 }
0x26c2   : > { %4621 = vst.msk [vmem:[#allocation2 + $0x10] sm:$0xff] %vm1435_vm3, %v7695_v35  ;;  %v5029_v48 = vld [vmem:[#allocation2 + $0x18] sm:$0xff] }
0x26c3   : > { %v5030_v32 = vld [vmem:[#allocation2 + $0x20] sm:$0xff] }
0x26c4   : > { %5156 = vmatprep.mubr.f32.mxu1 %v5030_v32 }
0x26c5   : > { %5157 = vmatmul.mubr.f32.gmra.mrb[38].mxu1 %v5029_v48 }
0x2728   : > { %v5021_v62 = vpop.permute.xlu1 %5020 }
0x2729   : > { %5025 = vst.msk [vmem:[#allocation2 + $0x28] sm:$0xff] %vm1839_vm4, %v5021_v62  ;;  %v5019_v63 = vpop.permute.xlu0 %5018 }
0x272a   : > { %5024 = vst.msk [vmem:[#allocation2 + $0x10] sm:$0xff] %vm1839_vm4, %v5019_v63 }
0x2730   : > { %v5031_v3 = vld [vmem:[#allocation2 + $0x28] sm:$0xff] }
0x2731   : > { %v5028_v1 = vld [vmem:[#allocation2 + $0x10] sm:$0xff] }
0x2732   : > { %6383 = vmatprep.mubr.f32.mxu0 %v5028_v1 }
0x2733   : > { %6384 = vmatmul.mubr.f32.vlgmr.msra.gmra.mrb[36].mxu0 %v5031_v3 }
0x2790   : > { %v5813_v44 = vpop.f32.mrb[36].mxu1 }
0x2791   : > { %v5814_v12 = vpop.f32.mrb[37].mxu1 }
0x2792   : > { %v5815_v2 = vadd.f32 %v5814_v12, %v5813_v44 }
0x2794   : > { %v5154_v14 = vadd.f32 %v5815_v2, %v5490_v8 }
0x2798   : > { %v5816_v5 = vpop.f32.mrb[38].mxu1 }
0x2799   : > { %v5817_v35 = vpop.f32.mrb[39].mxu1 }
0x279a   : > { %v5818_v7 = vadd.f32 %v5817_v35, %v5816_v5 }
0x279c   : > { %v5159_v10 = vadd.f32 %v5818_v7, %v5490_v8 }
0x2806   : > { %v6385_v11 = vpop.f32.mrb[36].mxu0 }
0x2807   : > { %v5234_v47 = vadd.f32 %v6385_v11, %v5159_v10  ;;  %v5228_v61 = vpop.f32.mrb[37].mxu0 }
0x2808   : > { %v5229_v22 = vadd.f32 %v5228_v61, %v5154_v14 }
0x2809   : > { %5238 = vst [vmem:[%s224_s12 + $0x8] sm:$0xff] %v5234_v47 }
0x280a   : > { %5237 = vst [vmem:[%s224_s12] sm:$0xff] %v5229_v22 }
0x280b PF: > { %s15_s18 = sadd.s32 1, %s7021_s18  }
0x280c   : > { %p12_p4 = scmp.ge.s32.totalorder %s15_s18, 4  }
0x280e   :  { %14 = sbr.rel (!%p12_p4) target bundleno = 1 (0x1), region = 81 }

</bundles_post_ra>
